<compile_context>
chip_gen: v6e
topology: v6e:2x2x1
jax: 0.10.0
libtpu: 0.0.40
codegen_flags: <defaults>
</compile_context>

<pallas_src>
import random

import jax
import jax.numpy as jnp
from jax import lax
from jax.experimental import pallas as pl
from jax.experimental.pallas import tpu as pltpu


# -----------------------------------------------------------------------------
# In-kernel helpers
# -----------------------------------------------------------------------------
def _lstm_gates(gates, c_prev, H):
    """Apply PyTorch-ordered (i, f, g, o) LSTM gate nonlinearities (all f32)."""
    i_g = jax.nn.sigmoid(gates[:, 0 * H:1 * H])
    f_g = jax.nn.sigmoid(gates[:, 1 * H:2 * H])
    g_g = jnp.tanh(gates[:, 2 * H:3 * H])
    o_g = jax.nn.sigmoid(gates[:, 3 * H:4 * H])
    c_new = f_g * c_prev + i_g * g_g
    h_new = o_g * jnp.tanh(c_new)
    return h_new, c_new


# -----------------------------------------------------------------------------
# Fused encoder + decoder kernel
# -----------------------------------------------------------------------------
def seq2seq_kernel(tf_ref,
                   enc_x_ref, enc_wih_ref, enc_whh_ref, enc_b_ref,
                   trg_oh_ref, dec_emb_ref, dec_wih_ref, dec_whh_ref, dec_b_ref,
                   fcw_ref, fcb_ref,
                   out_ref,
                   h_sc, c_sc, x0_sc):
    """One kernel for the whole Seq2Seq forward.

    tf_ref     : [Tt] int32 teacher-forcing mask (SMEM); index t used at step t
    enc_x_ref  : [Ts*B, E]  bf16 pre-embedded source tokens (time-major, flattened)
    enc_wih/whh: [L, E, 4H] / [L, H, 4H] bf16     enc_b : [L, 1, 4H] f32 (b_ih+b_hh)
    trg_oh_ref : [Tt, B, V] bf16 one-hot targets   dec_emb: [V, E] bf16
    dec_wih/whh/dec_b : decoder LSTM weights (same layout as encoder)
    fcw_ref    : [H, V] bf16                       fcb_ref: [1, V] f32
    out_ref    : [Tt, B, V] f32 logits (row 0 stays zero, like the reference)
    h_sc, c_sc : [L, B, H] f32 scratch             x0_sc : [Ts*B, 4H] f32 scratch
    """
    Tt, B, V = out_ref.shape
    L = enc_wih_ref.shape[0]
    H4 = enc_wih_ref.shape[2]
    H = H4 // 4
    Ts = x0_sc.shape[0] // B
    bf16 = jnp.bfloat16

    # ------------------------------ Encoder ---------------------------------
    h_sc[...] = jnp.zeros_like(h_sc)
    c_sc[...] = jnp.zeros_like(c_sc)

    # Layer-0 input projection for ALL timesteps as one big matmul (M = Ts*B),
    # off the serial dependency chain.
    x0_sc[...] = jnp.dot(enc_x_ref[...], enc_wih_ref[0],
                         preferred_element_type=jnp.float32)

    def enc_step(t, carry):
        start = pl.multiple_of(t * B, B)
        # Layer 0: input projection is precomputed; only h @ W_hh on the
        # recurrent path.
        gates = (x0_sc[pl.ds(start, B), :]
                 + jnp.dot(h_sc[0].astype(bf16), enc_whh_ref[0],
                           preferred_element_type=jnp.float32)
                 + enc_b_ref[0])
        h_new, c_new = _lstm_gates(gates, c_sc[0], H)
        h_sc[0] = h_new
        c_sc[0] = c_new
        x = h_new
        for l in range(1, L):                      # static layer loop
            gates = (jnp.dot(x.astype(bf16), enc_wih_ref[l],
                             preferred_element_type=jnp.float32)
                     + jnp.dot(h_sc[l].astype(bf16), enc_whh_ref[l],
                               preferred_element_type=jnp.float32)
                     + enc_b_ref[l])
            h_new, c_new = _lstm_gates(gates, c_sc[l], H)
            h_sc[l] = h_new
            c_sc[l] = c_new
            x = h_new
        return carry

    lax.fori_loop(0, Ts, enc_step, 0)

    # ------------------------------ Decoder ---------------------------------
    out_ref[0] = jnp.zeros((B, V), jnp.float32)
    col = lax.broadcasted_iota(jnp.int32, (B, V), 1)

    def dec_step(t, x_oh):
        # Embedding lookup as a one-hot matmul (MXU-friendly, no gather).
        x = jnp.dot(x_oh, dec_emb_ref[...], preferred_element_type=jnp.float32)
        for l in range(L):
            gates = (jnp.dot(x.astype(bf16), dec_wih_ref[l],
                             preferred_element_type=jnp.float32)
                     + jnp.dot(h_sc[l].astype(bf16), dec_whh_ref[l],
                               preferred_element_type=jnp.float32)
                     + dec_b_ref[l])
            h_new, c_new = _lstm_gates(gates, c_sc[l], H)
            h_sc[l] = h_new
            c_sc[l] = c_new
            x = h_new

        # Output projection fused into the same kernel; logits stay f32.
        logits = (jnp.dot(x.astype(bf16), fcw_ref[...],
                          preferred_element_type=jnp.float32)
                  + fcb_ref[...])
        out_ref[t] = logits

        # Greedy next token as a one-hot (first-argmax semantics, f32 compare).
        m = jnp.max(logits, axis=1, keepdims=True)
        idx = jnp.min(jnp.where(logits == m, col, V), axis=1, keepdims=True)
        top1 = (col == idx).astype(jnp.float32)

        # Teacher forcing: exact {0,1} blend in f32, cast to bf16 for the next
        # embedding matmul.
        tf = (tf_ref[t] > 0).astype(jnp.float32)
        nxt = tf * trg_oh_ref[t].astype(jnp.float32) + (1.0 - tf) * top1
        return nxt.astype(bf16)

    lax.fori_loop(1, Tt, dec_step, trg_oh_ref[0])


# -----------------------------------------------------------------------------
# pallas_call wrapper (gridless: whole working set << VMEM; loops live in-kernel)
# -----------------------------------------------------------------------------
_VMEM = pl.BlockSpec(memory_space=pltpu.MemorySpace.VMEM)
_SMEM = pl.BlockSpec(memory_space=pltpu.MemorySpace.SMEM)


def seq2seq_pallas(tf_mask, enc_x, enc_wih, enc_whh, enc_b,
                   trg_oh, dec_emb, dec_wih, dec_whh, dec_b, fc_w, fc_b):
    Tt, B, V = trg_oh.shape
    L, _, H4 = enc_wih.shape
    H = H4 // 4
    TsB = enc_x.shape[0]
    return pl.pallas_call(
        seq2seq_kernel,
        out_shape=jax.ShapeDtypeStruct((Tt, B, V), jnp.float32),
        in_specs=[_SMEM] + [_VMEM] * 11,
        out_specs=_VMEM,
        scratch_shapes=[pltpu.VMEM((L, B, H), jnp.float32),   # h state
                        pltpu.VMEM((L, B, H), jnp.float32),   # c state
                        pltpu.VMEM((TsB, H4), jnp.float32)],  # enc layer-0 proj
    )(tf_mask, enc_x, enc_wih, enc_whh, enc_b,
      trg_oh, dec_emb, dec_wih, dec_whh, dec_b, fc_w, fc_b)


# -----------------------------------------------------------------------------
# Parameter construction (mirrors the PyTorch module __init__)
# -----------------------------------------------------------------------------
def make_params(key, input_dim, output_dim, embedding_dim, hidden_dim, n_layers):
    # Stacked [L, E, 4H] W_ih layout requires E == H because layers > 0 take the
    # H-dim hidden of the layer below as input (true for this model config).
    assert embedding_dim == hidden_dim, "stacked W_ih layout assumes E == H"

    def nrm(k, shape, scale=0.05, dtype=jnp.float32):
        return (jax.random.normal(k, shape, dtype=jnp.float32) * scale).astype(dtype)

    keys = iter(jax.random.split(key, 16))
    E, H = embedding_dim, hidden_dim
    bf16 = jnp.bfloat16
    # NOTE: if real PyTorch weights are ported, W_ih/W_hh must be transposed to
    # [in, 4H] and the bias must be b_ih + b_hh (single combined tensor here).
    return {
        "enc_embedding": nrm(next(keys), (input_dim, E), dtype=bf16),
        "dec_embedding": nrm(next(keys), (output_dim, E), dtype=bf16),
        "fc_out_w": nrm(next(keys), (H, output_dim), dtype=bf16),
        "fc_out_b": nrm(next(keys), (1, output_dim)),
        "enc_wih": nrm(next(keys), (n_layers, E, 4 * H), dtype=bf16),
        "enc_whh": nrm(next(keys), (n_layers, H, 4 * H), dtype=bf16),
        "enc_b": nrm(next(keys), (n_layers, 1, 4 * H)),
        "dec_wih": nrm(next(keys), (n_layers, E, 4 * H), dtype=bf16),
        "dec_whh": nrm(next(keys), (n_layers, H, 4 * H), dtype=bf16),
        "dec_b": nrm(next(keys), (n_layers, 1, 4 * H)),
    }


# -----------------------------------------------------------------------------
# Model forward (matches Seq2Seq.forward semantics), fully jit-able
# -----------------------------------------------------------------------------
@jax.jit
def seq2seq_forward(params, src, trg, tf_mask):
    Ts, B = src.shape
    E = params["enc_embedding"].shape[1]
    V = params["fc_out_w"].shape[1]

    # Encoder embedding gather (XLA), flattened time-major to [Ts*B, E] bf16.
    enc_x = jnp.take(params["enc_embedding"], src, axis=0).reshape(Ts * B, E)
    # Decoder targets as one-hot bf16 (consumed by the in-kernel embedding matmul
    # and the teacher-forcing blend).
    trg_oh = jax.nn.one_hot(trg, V, dtype=jnp.bfloat16)

    return seq2seq_pallas(tf_mask, enc_x,
                          params["enc_wih"], params["enc_whh"], params["enc_b"],
                          trg_oh, params["dec_embedding"],
                          params["dec_wih"], params["dec_whh"], params["dec_b"],
                          params["fc_out_w"], params["fc_out_b"])


# -----------------------------------------------------------------------------
# Main
# -----------------------------------------------------------------------------
if __name__ == "__main__":
    random.seed(0)  # deterministic teacher-forcing draws

    INPUT_DIM = 128      # encoder vocab
    OUTPUT_DIM = 128     # decoder vocab
    EMBEDDING_DIM = 128
    HIDDEN_DIM = 128
    N_LAYERS = 2
    BATCH = 8
    SRC_LEN = 6
    TRG_LEN = 5
    TEACHER_FORCING_RATIO = 0.5

    key = jax.random.PRNGKey(0)
    k_params, k_src, k_trg = jax.random.split(key, 3)

    params = make_params(k_params, INPUT_DIM, OUTPUT_DIM, EMBEDDING_DIM,
                         HIDDEN_DIM, N_LAYERS)

    src = jax.random.randint(k_src, (SRC_LEN, BATCH), 0, INPUT_DIM,
                             dtype=jnp.int32)
    trg = jax.random.randint(k_trg, (TRG_LEN, BATCH), 0, OUTPUT_DIM,
                             dtype=jnp.int32)

    # Host-side teacher-forcing schedule: one random.random() draw per decoder
    # step t = 1..TRG_LEN-1, same sampling order as the PyTorch loop; passed to
    # the fused kernel as an SMEM int32 mask so the forward stays jit-able.
    tf_mask = jnp.array(
        [0] + [int(random.random() < TEACHER_FORCING_RATIO)
               for _ in range(1, TRG_LEN)],
        dtype=jnp.int32)

    outputs = seq2seq_forward(params, src, trg, tf_mask)
    outputs = jax.block_until_ready(outputs)

    assert outputs.shape == (TRG_LEN, BATCH, OUTPUT_DIM)
    assert bool(jnp.all(jnp.isfinite(outputs)))
    print("KERNEL_OK")
</pallas_src>

<mosaic_0001>
module attributes {stable_mosaic.version = 11 : i64} {
  func.func @seq2seq_kernel(%arg0: memref<5xi32, #tpu.memory_space<smem>>, %arg1: memref<48x128xbf16, #tpu.memory_space<vmem>>, %arg2: memref<2x128x512xbf16, #tpu.memory_space<vmem>>, %arg3: memref<2x128x512xbf16, #tpu.memory_space<vmem>>, %arg4: memref<2x1x512xf32, #tpu.memory_space<vmem>>, %arg5: memref<5x8x128xbf16, #tpu.memory_space<vmem>>, %arg6: memref<128x128xbf16, #tpu.memory_space<vmem>>, %arg7: memref<2x128x512xbf16, #tpu.memory_space<vmem>>, %arg8: memref<2x128x512xbf16, #tpu.memory_space<vmem>>, %arg9: memref<2x1x512xf32, #tpu.memory_space<vmem>>, %arg10: memref<128x128xbf16, #tpu.memory_space<vmem>>, %arg11: memref<1x128xf32, #tpu.memory_space<vmem>>, %arg12: memref<5x8x128xf32, #tpu.memory_space<vmem>>, %arg13: memref<2x8x128xf32, #tpu.memory_space<vmem>>, %arg14: memref<2x8x128xf32, #tpu.memory_space<vmem>>, %arg15: memref<48x512xf32, #tpu.memory_space<vmem>>) attributes {dimension_semantics = [], scalar_prefetch = 0 : i64, scratch_operands = 3 : i64, tpu.core_type = #tpu.core_type<tc>} {
    %cst = arith.constant 0.000000e+00 : f32
    %0 = vector.broadcast %cst : f32 to vector<2x8x128xf32>
    %c0 = arith.constant 0 : index
    %c0_0 = arith.constant 0 : index
    %c0_1 = arith.constant 0 : index
    %1 = vector.load %arg13[%c0, %c0_0, %c0_1] : memref<2x8x128xf32, #tpu.memory_space<vmem>>, vector<2x8x128xf32>
    tpu.vector_store %arg13[%c0, %c0_0, %c0_1], %0 {strides = array<i32>} : memref<2x8x128xf32, #tpu.memory_space<vmem>>, vector<2x8x128xf32>,
    %cst_2 = arith.constant 0.000000e+00 : f32
    %2 = vector.broadcast %cst_2 : f32 to vector<2x8x128xf32>
    %c0_3 = arith.constant 0 : index
    %c0_4 = arith.constant 0 : index
    %c0_5 = arith.constant 0 : index
    %3 = vector.load %arg14[%c0_3, %c0_4, %c0_5] : memref<2x8x128xf32, #tpu.memory_space<vmem>>, vector<2x8x128xf32>
    tpu.vector_store %arg14[%c0_3, %c0_4, %c0_5], %2 {strides = array<i32>} : memref<2x8x128xf32, #tpu.memory_space<vmem>>, vector<2x8x128xf32>,
    %c0_6 = arith.constant 0 : index
    %c0_7 = arith.constant 0 : index
    %4 = vector.load %arg1[%c0_6, %c0_7] : memref<48x128xbf16, #tpu.memory_space<vmem>>, vector<48x128xbf16>
    %c0_8 = arith.constant 0 : index
    %c0_9 = arith.constant 0 : index
    %c0_10 = arith.constant 0 : index
    %5 = vector.load %arg2[%c0_8, %c0_9, %c0_10] : memref<2x128x512xbf16, #tpu.memory_space<vmem>>, vector<1x128x512xbf16>
    %6 = vector.shape_cast %5 : vector<1x128x512xbf16> to vector<128x512xbf16>
    %cst_11 = arith.constant dense<0.000000e+00> : vector<48x512xf32>
    %7 = tpu.matmul %4, %6, %cst_11 {dimension_numbers = #tpu.dot_dimension_numbers<[1], [0], [0], [1], [0, 0, 1, 1], [], []>} : vector<48x128xbf16>, vector<128x512xbf16>, vector<48x512xf32> -> vector<48x512xf32>
    %c0_12 = arith.constant 0 : index
    %c0_13 = arith.constant 0 : index
    %8 = vector.load %arg15[%c0_12, %c0_13] : memref<48x512xf32, #tpu.memory_space<vmem>>, vector<48x512xf32>
    tpu.vector_store %arg15[%c0_12, %c0_13], %7 {strides = array<i32>} : memref<48x512xf32, #tpu.memory_space<vmem>>, vector<48x512xf32>,
    %c0_i32 = arith.constant 0 : i32
    %c6_i32 = arith.constant 6 : i32
    %9 = arith.addi %c0_i32, %c6_i32 : i32
    %c1_i32 = arith.constant 1 : i32
    scf.for %arg16 = %c0_i32 to %9 step %c1_i32  : i32 {
      %c8_i32 = arith.constant 8 : i32
      %19 = arith.muli %arg16, %c8_i32 : i32
      %20 = tpu.assume_multiple %19, 8 : i32
      %21 = arith.index_cast %20 : i32 to index
      %c0_25 = arith.constant 0 : index
      %22 = vector.load %arg15[%21, %c0_25] : memref<48x512xf32, #tpu.memory_space<vmem>>, vector<8x512xf32>
      %c0_26 = arith.constant 0 : index
      %c0_27 = arith.constant 0 : index
      %c0_28 = arith.constant 0 : index
      %23 = vector.load %arg13[%c0_26, %c0_27, %c0_28] : memref<2x8x128xf32, #tpu.memory_space<vmem>>, vector<1x8x128xf32>
      %24 = vector.shape_cast %23 : vector<1x8x128xf32> to vector<8x128xf32>
      %25 = arith.truncf %24 : vector<8x128xf32> to vector<8x128xbf16>
      %c0_29 = arith.constant 0 : index
      %c0_30 = arith.constant 0 : index
      %c0_31 = arith.constant 0 : index
      %26 = vector.load %arg3[%c0_29, %c0_30, %c0_31] : memref<2x128x512xbf16, #tpu.memory_space<vmem>>, vector<1x128x512xbf16>
      %27 = vector.shape_cast %26 : vector<1x128x512xbf16> to vector<128x512xbf16>
      %cst_32 = arith.constant dense<0.000000e+00> : vector<8x512xf32>
      %28 = tpu.matmul %25, %27, %cst_32 {dimension_numbers = #tpu.dot_dimension_numbers<[1], [0], [0], [1], [0, 0, 1, 1], [], []>} : vector<8x128xbf16>, vector<128x512xbf16>, vector<8x512xf32> -> vector<8x512xf32>
      %29 = arith.addf %22, %28 : vector<8x512xf32>
      %c0_33 = arith.constant 0 : index
      %c0_34 = arith.constant 0 : index
      %c0_35 = arith.constant 0 : index
      %30 = vector.load %arg4[%c0_33, %c0_34, %c0_35] : memref<2x1x512xf32, #tpu.memory_space<vmem>>, vector<1x1x512xf32>
      %31 = vector.shape_cast %30 : vector<1x1x512xf32> to vector<1x512xf32>
      %32 = vector.broadcast %31 : vector<1x512xf32> to vector<8x512xf32>
      %33 = arith.addf %29, %32 : vector<8x512xf32>
      %c0_36 = arith.constant 0 : index
      %c0_37 = arith.constant 0 : index
      %c0_38 = arith.constant 0 : index
      %34 = vector.load %arg14[%c0_36, %c0_37, %c0_38] : memref<2x8x128xf32, #tpu.memory_space<vmem>>, vector<1x8x128xf32>
      %35 = vector.shape_cast %34 : vector<1x8x128xf32> to vector<8x128xf32>
      %36 = vector.extract_strided_slice %33 {offsets = [0, 0], sizes = [8, 128], strides = [1, 1]} : vector<8x512xf32> to vector<8x128xf32>
      %37 = arith.negf %36 : vector<8x128xf32>
      %38 = math.exp %37 : vector<8x128xf32>
      %cst_39 = arith.constant 1.000000e+00 : f32
      %39 = vector.broadcast %cst_39 : f32 to vector<8x128xf32>
      %40 = arith.addf %39, %38 : vector<8x128xf32>
      %41 = arith.divf %39, %40 : vector<8x128xf32>
      %42 = vector.extract_strided_slice %33 {offsets = [0, 128], sizes = [8, 128], strides = [1, 1]} : vector<8x512xf32> to vector<8x128xf32>
      %43 = arith.negf %42 : vector<8x128xf32>
      %44 = math.exp %43 : vector<8x128xf32>
      %cst_40 = arith.constant 1.000000e+00 : f32
      %45 = vector.broadcast %cst_40 : f32 to vector<8x128xf32>
      %46 = arith.addf %45, %44 : vector<8x128xf32>
      %47 = arith.divf %45, %46 : vector<8x128xf32>
      %48 = vector.extract_strided_slice %33 {offsets = [0, 256], sizes = [8, 128], strides = [1, 1]} : vector<8x512xf32> to vector<8x128xf32>
      %49 = math.tanh %48 : vector<8x128xf32>
      %50 = vector.extract_strided_slice %33 {offsets = [0, 384], sizes = [8, 128], strides = [1, 1]} : vector<8x512xf32> to vector<8x128xf32>
      %51 = arith.negf %50 : vector<8x128xf32>
      %52 = math.exp %51 : vector<8x128xf32>
      %cst_41 = arith.constant 1.000000e+00 : f32
      %53 = vector.broadcast %cst_41 : f32 to vector<8x128xf32>
      %54 = arith.addf %53, %52 : vector<8x128xf32>
      %55 = arith.divf %53, %54 : vector<8x128xf32>
      %56 = arith.mulf %47, %35 : vector<8x128xf32>
      %57 = arith.mulf %41, %49 : vector<8x128xf32>
      %58 = arith.addf %56, %57 : vector<8x128xf32>
      %59 = math.tanh %58 : vector<8x128xf32>
      %60 = arith.mulf %55, %59 : vector<8x128xf32>
      %c0_42 = arith.constant 0 : index
      %c0_43 = arith.constant 0 : index
      %c0_44 = arith.constant 0 : index
      %61 = vector.load %arg13[%c0_42, %c0_43, %c0_44] : memref<2x8x128xf32, #tpu.memory_space<vmem>>, vector<1x8x128xf32>
      %62 = vector.shape_cast %61 : vector<1x8x128xf32> to vector<8x128xf32>
      %63 = vector.shape_cast %60 : vector<8x128xf32> to vector<1x8x128xf32>
      tpu.vector_store %arg13[%c0_42, %c0_43, %c0_44], %63 {strides = array<i32>} : memref<2x8x128xf32, #tpu.memory_space<vmem>>, vector<1x8x128xf32>,
      %c0_45 = arith.constant 0 : index
      %c0_46 = arith.constant 0 : index
      %c0_47 = arith.constant 0 : index
      %64 = vector.load %arg14[%c0_45, %c0_46, %c0_47] : memref<2x8x128xf32, #tpu.memory_space<vmem>>, vector<1x8x128xf32>
      %65 = vector.shape_cast %64 : vector<1x8x128xf32> to vector<8x128xf32>
      %66 = vector.shape_cast %58 : vector<8x128xf32> to vector<1x8x128xf32>
      tpu.vector_store %arg14[%c0_45, %c0_46, %c0_47], %66 {strides = array<i32>} : memref<2x8x128xf32, #tpu.memory_space<vmem>>, vector<1x8x128xf32>,
      %67 = arith.truncf %60 : vector<8x128xf32> to vector<8x128xbf16>
      %c1 = arith.constant 1 : index
      %c0_48 = arith.constant 0 : index
      %c0_49 = arith.constant 0 : index
      %68 = vector.load %arg2[%c1, %c0_48, %c0_49] : memref<2x128x512xbf16, #tpu.memory_space<vmem>>, vector<1x128x512xbf16>
      %69 = vector.shape_cast %68 : vector<1x128x512xbf16> to vector<128x512xbf16>
      %cst_50 = arith.constant dense<0.000000e+00> : vector<8x512xf32>
      %70 = tpu.matmul %67, %69, %cst_50 {dimension_numbers = #tpu.dot_dimension_numbers<[1], [0], [0], [1], [0, 0, 1, 1], [], []>} : vector<8x128xbf16>, vector<128x512xbf16>, vector<8x512xf32> -> vector<8x512xf32>
      %c1_51 = arith.constant 1 : index
      %c0_52 = arith.constant 0 : index
      %c0_53 = arith.constant 0 : index
      %71 = vector.load %arg13[%c1_51, %c0_52, %c0_53] : memref<2x8x128xf32, #tpu.memory_space<vmem>>, vector<1x8x128xf32>
      %72 = vector.shape_cast %71 : vector<1x8x128xf32> to vector<8x128xf32>
      %73 = arith.truncf %72 : vector<8x128xf32> to vector<8x128xbf16>
      %c1_54 = arith.constant 1 : index
      %c0_55 = arith.constant 0 : index
      %c0_56 = arith.constant 0 : index
      %74 = vector.load %arg3[%c1_54, %c0_55, %c0_56] : memref<2x128x512xbf16, #tpu.memory_space<vmem>>, vector<1x128x512xbf16>
      %75 = vector.shape_cast %74 : vector<1x128x512xbf16> to vector<128x512xbf16>
      %cst_57 = arith.constant dense<0.000000e+00> : vector<8x512xf32>
      %76 = tpu.matmul %73, %75, %cst_57 {dimension_numbers = #tpu.dot_dimension_numbers<[1], [0], [0], [1], [0, 0, 1, 1], [], []>} : vector<8x128xbf16>, vector<128x512xbf16>, vector<8x512xf32> -> vector<8x512xf32>
      %77 = arith.addf %70, %76 : vector<8x512xf32>
      %c1_58 = arith.constant 1 : index
      %c0_59 = arith.constant 0 : index
      %c0_60 = arith.constant 0 : index
      %78 = vector.load %arg4[%c1_58, %c0_59, %c0_60] : memref<2x1x512xf32, #tpu.memory_space<vmem>>, vector<1x1x512xf32>
      %79 = vector.shape_cast %78 : vector<1x1x512xf32> to vector<1x512xf32>
      %80 = vector.broadcast %79 : vector<1x512xf32> to vector<8x512xf32>
      %81 = arith.addf %77, %80 : vector<8x512xf32>
      %c1_61 = arith.constant 1 : index
      %c0_62 = arith.constant 0 : index
      %c0_63 = arith.constant 0 : index
      %82 = vector.load %arg14[%c1_61, %c0_62, %c0_63] : memref<2x8x128xf32, #tpu.memory_space<vmem>>, vector<1x8x128xf32>
      %83 = vector.shape_cast %82 : vector<1x8x128xf32> to vector<8x128xf32>
      %84 = vector.extract_strided_slice %81 {offsets = [0, 0], sizes = [8, 128], strides = [1, 1]} : vector<8x512xf32> to vector<8x128xf32>
      %85 = arith.negf %84 : vector<8x128xf32>
      %86 = math.exp %85 : vector<8x128xf32>
      %cst_64 = arith.constant 1.000000e+00 : f32
      %87 = vector.broadcast %cst_64 : f32 to vector<8x128xf32>
      %88 = arith.addf %87, %86 : vector<8x128xf32>
      %89 = arith.divf %87, %88 : vector<8x128xf32>
      %90 = vector.extract_strided_slice %81 {offsets = [0, 128], sizes = [8, 128], strides = [1, 1]} : vector<8x512xf32> to vector<8x128xf32>
      %91 = arith.negf %90 : vector<8x128xf32>
      %92 = math.exp %91 : vector<8x128xf32>
      %cst_65 = arith.constant 1.000000e+00 : f32
      %93 = vector.broadcast %cst_65 : f32 to vector<8x128xf32>
      %94 = arith.addf %93, %92 : vector<8x128xf32>
      %95 = arith.divf %93, %94 : vector<8x128xf32>
      %96 = vector.extract_strided_slice %81 {offsets = [0, 256], sizes = [8, 128], strides = [1, 1]} : vector<8x512xf32> to vector<8x128xf32>
      %97 = math.tanh %96 : vector<8x128xf32>
      %98 = vector.extract_strided_slice %81 {offsets = [0, 384], sizes = [8, 128], strides = [1, 1]} : vector<8x512xf32> to vector<8x128xf32>
      %99 = arith.negf %98 : vector<8x128xf32>
      %100 = math.exp %99 : vector<8x128xf32>
      %cst_66 = arith.constant 1.000000e+00 : f32
      %101 = vector.broadcast %cst_66 : f32 to vector<8x128xf32>
      %102 = arith.addf %101, %100 : vector<8x128xf32>
      %103 = arith.divf %101, %102 : vector<8x128xf32>
      %104 = arith.mulf %95, %83 : vector<8x128xf32>
      %105 = arith.mulf %89, %97 : vector<8x128xf32>
      %106 = arith.addf %104, %105 : vector<8x128xf32>
      %107 = math.tanh %106 : vector<8x128xf32>
      %108 = arith.mulf %103, %107 : vector<8x128xf32>
      %c1_67 = arith.constant 1 : index
      %c0_68 = arith.constant 0 : index
      %c0_69 = arith.constant 0 : index
      %109 = vector.load %arg13[%c1_67, %c0_68, %c0_69] : memref<2x8x128xf32, #tpu.memory_space<vmem>>, vector<1x8x128xf32>
      %110 = vector.shape_cast %109 : vector<1x8x128xf32> to vector<8x128xf32>
      %111 = vector.shape_cast %108 : vector<8x128xf32> to vector<1x8x128xf32>
      tpu.vector_store %arg13[%c1_67, %c0_68, %c0_69], %111 {strides = array<i32>} : memref<2x8x128xf32, #tpu.memory_space<vmem>>, vector<1x8x128xf32>,
      %c1_70 = arith.constant 1 : index
      %c0_71 = arith.constant 0 : index
      %c0_72 = arith.constant 0 : index
      %112 = vector.load %arg14[%c1_70, %c0_71, %c0_72] : memref<2x8x128xf32, #tpu.memory_space<vmem>>, vector<1x8x128xf32>
      %113 = vector.shape_cast %112 : vector<1x8x128xf32> to vector<8x128xf32>
      %114 = vector.shape_cast %106 : vector<8x128xf32> to vector<1x8x128xf32>
      tpu.vector_store %arg14[%c1_70, %c0_71, %c0_72], %114 {strides = array<i32>} : memref<2x8x128xf32, #tpu.memory_space<vmem>>, vector<1x8x128xf32>,
    }
    %c6_i32_14 = arith.constant 6 : i32
    %cst_15 = arith.constant 0.000000e+00 : f32
    %10 = vector.broadcast %cst_15 : f32 to vector<8x128xf32>
    %c0_16 = arith.constant 0 : index
    %c0_17 = arith.constant 0 : index
    %c0_18 = arith.constant 0 : index
    %11 = vector.load %arg12[%c0_16, %c0_17, %c0_18] : memref<5x8x128xf32, #tpu.memory_space<vmem>>, vector<1x8x128xf32>
    %12 = vector.shape_cast %11 : vector<1x8x128xf32> to vector<8x128xf32>
    %13 = vector.shape_cast %10 : vector<8x128xf32> to vector<1x8x128xf32>
    tpu.vector_store %arg12[%c0_16, %c0_17, %c0_18], %13 {strides = array<i32>} : memref<5x8x128xf32, #tpu.memory_space<vmem>>, vector<1x8x128xf32>,
    %14 = tpu.iota {dimensions = array<i32: 1>} : vector<8x128xi32>
    %c0_19 = arith.constant 0 : index
    %c0_20 = arith.constant 0 : index
    %c0_21 = arith.constant 0 : index
    %15 = vector.load %arg5[%c0_19, %c0_20, %c0_21] : memref<5x8x128xbf16, #tpu.memory_space<vmem>>, vector<1x8x128xbf16>
    %16 = vector.shape_cast %15 : vector<1x8x128xbf16> to vector<8x128xbf16>
    %c1_i32_22 = arith.constant 1 : i32
    %c4_i32 = arith.constant 4 : i32
    %17 = arith.addi %c1_i32_22, %c4_i32 : i32
    %c1_i32_23 = arith.constant 1 : i32
    %18 = scf.for %arg16 = %c1_i32_22 to %17 step %c1_i32_23 iter_args(%arg17 = %16) -> (vector<8x128xbf16>)  : i32 {
      %c0_25 = arith.constant 0 : index
      %c0_26 = arith.constant 0 : index
      %19 = vector.load %arg6[%c0_25, %c0_26] : memref<128x128xbf16, #tpu.memory_space<vmem>>, vector<128x128xbf16>
      %cst_27 = arith.constant dense<0.000000e+00> : vector<8x128xf32>
      %20 = tpu.matmul %arg17, %19, %cst_27 {dimension_numbers = #tpu.dot_dimension_numbers<[1], [0], [0], [1], [0, 0, 1, 1], [], []>} : vector<8x128xbf16>, vector<128x128xbf16>, vector<8x128xf32> -> vector<8x128xf32>
      %21 = arith.truncf %20 : vector<8x128xf32> to vector<8x128xbf16>
      %c0_28 = arith.constant 0 : index
      %c0_29 = arith.constant 0 : index
      %c0_30 = arith.constant 0 : index
      %22 = vector.load %arg7[%c0_28, %c0_29, %c0_30] : memref<2x128x512xbf16, #tpu.memory_space<vmem>>, vector<1x128x512xbf16>
      %23 = vector.shape_cast %22 : vector<1x128x512xbf16> to vector<128x512xbf16>
      %cst_31 = arith.constant dense<0.000000e+00> : vector<8x512xf32>
      %24 = tpu.matmul %21, %23, %cst_31 {dimension_numbers = #tpu.dot_dimension_numbers<[1], [0], [0], [1], [0, 0, 1, 1], [], []>} : vector<8x128xbf16>, vector<128x512xbf16>, vector<8x512xf32> -> vector<8x512xf32>
      %c0_32 = arith.constant 0 : index
      %c0_33 = arith.constant 0 : index
      %c0_34 = arith.constant 0 : index
      %25 = vector.load %arg13[%c0_32, %c0_33, %c0_34] : memref<2x8x128xf32, #tpu.memory_space<vmem>>, vector<1x8x128xf32>
      %26 = vector.shape_cast %25 : vector<1x8x128xf32> to vector<8x128xf32>
      %27 = arith.truncf %26 : vector<8x128xf32> to vector<8x128xbf16>
      %c0_35 = arith.constant 0 : index
      %c0_36 = arith.constant 0 : index
      %c0_37 = arith.constant 0 : index
      %28 = vector.load %arg8[%c0_35, %c0_36, %c0_37] : memref<2x128x512xbf16, #tpu.memory_space<vmem>>, vector<1x128x512xbf16>
      %29 = vector.shape_cast %28 : vector<1x128x512xbf16> to vector<128x512xbf16>
      %cst_38 = arith.constant dense<0.000000e+00> : vector<8x512xf32>
      %30 = tpu.matmul %27, %29, %cst_38 {dimension_numbers = #tpu.dot_dimension_numbers<[1], [0], [0], [1], [0, 0, 1, 1], [], []>} : vector<8x128xbf16>, vector<128x512xbf16>, vector<8x512xf32> -> vector<8x512xf32>
      %31 = arith.addf %24, %30 : vector<8x512xf32>
      %c0_39 = arith.constant 0 : index
      %c0_40 = arith.constant 0 : index
      %c0_41 = arith.constant 0 : index
      %32 = vector.load %arg9[%c0_39, %c0_40, %c0_41] : memref<2x1x512xf32, #tpu.memory_space<vmem>>, vector<1x1x512xf32>
      %33 = vector.shape_cast %32 : vector<1x1x512xf32> to vector<1x512xf32>
      %34 = vector.broadcast %33 : vector<1x512xf32> to vector<8x512xf32>
      %35 = arith.addf %31, %34 : vector<8x512xf32>
      %c0_42 = arith.constant 0 : index
      %c0_43 = arith.constant 0 : index
      %c0_44 = arith.constant 0 : index
      %36 = vector.load %arg14[%c0_42, %c0_43, %c0_44] : memref<2x8x128xf32, #tpu.memory_space<vmem>>, vector<1x8x128xf32>
      %37 = vector.shape_cast %36 : vector<1x8x128xf32> to vector<8x128xf32>
      %38 = vector.extract_strided_slice %35 {offsets = [0, 0], sizes = [8, 128], strides = [1, 1]} : vector<8x512xf32> to vector<8x128xf32>
      %39 = arith.negf %38 : vector<8x128xf32>
      %40 = math.exp %39 : vector<8x128xf32>
      %cst_45 = arith.constant 1.000000e+00 : f32
      %41 = vector.broadcast %cst_45 : f32 to vector<8x128xf32>
      %42 = arith.addf %41, %40 : vector<8x128xf32>
      %43 = arith.divf %41, %42 : vector<8x128xf32>
      %44 = vector.extract_strided_slice %35 {offsets = [0, 128], sizes = [8, 128], strides = [1, 1]} : vector<8x512xf32> to vector<8x128xf32>
      %45 = arith.negf %44 : vector<8x128xf32>
      %46 = math.exp %45 : vector<8x128xf32>
      %cst_46 = arith.constant 1.000000e+00 : f32
      %47 = vector.broadcast %cst_46 : f32 to vector<8x128xf32>
      %48 = arith.addf %47, %46 : vector<8x128xf32>
      %49 = arith.divf %47, %48 : vector<8x128xf32>
      %50 = vector.extract_strided_slice %35 {offsets = [0, 256], sizes = [8, 128], strides = [1, 1]} : vector<8x512xf32> to vector<8x128xf32>
      %51 = math.tanh %50 : vector<8x128xf32>
      %52 = vector.extract_strided_slice %35 {offsets = [0, 384], sizes = [8, 128], strides = [1, 1]} : vector<8x512xf32> to vector<8x128xf32>
      %53 = arith.negf %52 : vector<8x128xf32>
      %54 = math.exp %53 : vector<8x128xf32>
      %cst_47 = arith.constant 1.000000e+00 : f32
      %55 = vector.broadcast %cst_47 : f32 to vector<8x128xf32>
      %56 = arith.addf %55, %54 : vector<8x128xf32>
      %57 = arith.divf %55, %56 : vector<8x128xf32>
      %58 = arith.mulf %49, %37 : vector<8x128xf32>
      %59 = arith.mulf %43, %51 : vector<8x128xf32>
      %60 = arith.addf %58, %59 : vector<8x128xf32>
      %61 = math.tanh %60 : vector<8x128xf32>
      %62 = arith.mulf %57, %61 : vector<8x128xf32>
      %c0_48 = arith.constant 0 : index
      %c0_49 = arith.constant 0 : index
      %c0_50 = arith.constant 0 : index
      %63 = vector.load %arg13[%c0_48, %c0_49, %c0_50] : memref<2x8x128xf32, #tpu.memory_space<vmem>>, vector<1x8x128xf32>
      %64 = vector.shape_cast %63 : vector<1x8x128xf32> to vector<8x128xf32>
      %65 = vector.shape_cast %62 : vector<8x128xf32> to vector<1x8x128xf32>
      tpu.vector_store %arg13[%c0_48, %c0_49, %c0_50], %65 {strides = array<i32>} : memref<2x8x128xf32, #tpu.memory_space<vmem>>, vector<1x8x128xf32>,
      %c0_51 = arith.constant 0 : index
      %c0_52 = arith.constant 0 : index
      %c0_53 = arith.constant 0 : index
      %66 = vector.load %arg14[%c0_51, %c0_52, %c0_53] : memref<2x8x128xf32, #tpu.memory_space<vmem>>, vector<1x8x128xf32>
      %67 = vector.shape_cast %66 : vector<1x8x128xf32> to vector<8x128xf32>
      %68 = vector.shape_cast %60 : vector<8x128xf32> to vector<1x8x128xf32>
      tpu.vector_store %arg14[%c0_51, %c0_52, %c0_53], %68 {strides = array<i32>} : memref<2x8x128xf32, #tpu.memory_space<vmem>>, vector<1x8x128xf32>,
      %69 = arith.truncf %62 : vector<8x128xf32> to vector<8x128xbf16>
      %c1 = arith.constant 1 : index
      %c0_54 = arith.constant 0 : index
      %c0_55 = arith.constant 0 : index
      %70 = vector.load %arg7[%c1, %c0_54, %c0_55] : memref<2x128x512xbf16, #tpu.memory_space<vmem>>, vector<1x128x512xbf16>
      %71 = vector.shape_cast %70 : vector<1x128x512xbf16> to vector<128x512xbf16>
      %cst_56 = arith.constant dense<0.000000e+00> : vector<8x512xf32>
      %72 = tpu.matmul %69, %71, %cst_56 {dimension_numbers = #tpu.dot_dimension_numbers<[1], [0], [0], [1], [0, 0, 1, 1], [], []>} : vector<8x128xbf16>, vector<128x512xbf16>, vector<8x512xf32> -> vector<8x512xf32>
      %c1_57 = arith.constant 1 : index
      %c0_58 = arith.constant 0 : index
      %c0_59 = arith.constant 0 : index
      %73 = vector.load %arg13[%c1_57, %c0_58, %c0_59] : memref<2x8x128xf32, #tpu.memory_space<vmem>>, vector<1x8x128xf32>
      %74 = vector.shape_cast %73 : vector<1x8x128xf32> to vector<8x128xf32>
      %75 = arith.truncf %74 : vector<8x128xf32> to vector<8x128xbf16>
      %c1_60 = arith.constant 1 : index
      %c0_61 = arith.constant 0 : index
      %c0_62 = arith.constant 0 : index
      %76 = vector.load %arg8[%c1_60, %c0_61, %c0_62] : memref<2x128x512xbf16, #tpu.memory_space<vmem>>, vector<1x128x512xbf16>
      %77 = vector.shape_cast %76 : vector<1x128x512xbf16> to vector<128x512xbf16>
      %cst_63 = arith.constant dense<0.000000e+00> : vector<8x512xf32>
      %78 = tpu.matmul %75, %77, %cst_63 {dimension_numbers = #tpu.dot_dimension_numbers<[1], [0], [0], [1], [0, 0, 1, 1], [], []>} : vector<8x128xbf16>, vector<128x512xbf16>, vector<8x512xf32> -> vector<8x512xf32>
      %79 = arith.addf %72, %78 : vector<8x512xf32>
      %c1_64 = arith.constant 1 : index
      %c0_65 = arith.constant 0 : index
      %c0_66 = arith.constant 0 : index
      %80 = vector.load %arg9[%c1_64, %c0_65, %c0_66] : memref<2x1x512xf32, #tpu.memory_space<vmem>>, vector<1x1x512xf32>
      %81 = vector.shape_cast %80 : vector<1x1x512xf32> to vector<1x512xf32>
      %82 = vector.broadcast %81 : vector<1x512xf32> to vector<8x512xf32>
      %83 = arith.addf %79, %82 : vector<8x512xf32>
      %c1_67 = arith.constant 1 : index
      %c0_68 = arith.constant 0 : index
      %c0_69 = arith.constant 0 : index
      %84 = vector.load %arg14[%c1_67, %c0_68, %c0_69] : memref<2x8x128xf32, #tpu.memory_space<vmem>>, vector<1x8x128xf32>
      %85 = vector.shape_cast %84 : vector<1x8x128xf32> to vector<8x128xf32>
      %86 = vector.extract_strided_slice %83 {offsets = [0, 0], sizes = [8, 128], strides = [1, 1]} : vector<8x512xf32> to vector<8x128xf32>
      %87 = arith.negf %86 : vector<8x128xf32>
      %88 = math.exp %87 : vector<8x128xf32>
      %cst_70 = arith.constant 1.000000e+00 : f32
      %89 = vector.broadcast %cst_70 : f32 to vector<8x128xf32>
      %90 = arith.addf %89, %88 : vector<8x128xf32>
      %91 = arith.divf %89, %90 : vector<8x128xf32>
      %92 = vector.extract_strided_slice %83 {offsets = [0, 128], sizes = [8, 128], strides = [1, 1]} : vector<8x512xf32> to vector<8x128xf32>
      %93 = arith.negf %92 : vector<8x128xf32>
      %94 = math.exp %93 : vector<8x128xf32>
      %cst_71 = arith.constant 1.000000e+00 : f32
      %95 = vector.broadcast %cst_71 : f32 to vector<8x128xf32>
      %96 = arith.addf %95, %94 : vector<8x128xf32>
      %97 = arith.divf %95, %96 : vector<8x128xf32>
      %98 = vector.extract_strided_slice %83 {offsets = [0, 256], sizes = [8, 128], strides = [1, 1]} : vector<8x512xf32> to vector<8x128xf32>
      %99 = math.tanh %98 : vector<8x128xf32>
      %100 = vector.extract_strided_slice %83 {offsets = [0, 384], sizes = [8, 128], strides = [1, 1]} : vector<8x512xf32> to vector<8x128xf32>
      %101 = arith.negf %100 : vector<8x128xf32>
      %102 = math.exp %101 : vector<8x128xf32>
      %cst_72 = arith.constant 1.000000e+00 : f32
      %103 = vector.broadcast %cst_72 : f32 to vector<8x128xf32>
      %104 = arith.addf %103, %102 : vector<8x128xf32>
      %105 = arith.divf %103, %104 : vector<8x128xf32>
      %106 = arith.mulf %97, %85 : vector<8x128xf32>
      %107 = arith.mulf %91, %99 : vector<8x128xf32>
      %108 = arith.addf %106, %107 : vector<8x128xf32>
      %109 = math.tanh %108 : vector<8x128xf32>
      %110 = arith.mulf %105, %109 : vector<8x128xf32>
      %c1_73 = arith.constant 1 : index
      %c0_74 = arith.constant 0 : index
      %c0_75 = arith.constant 0 : index
      %111 = vector.load %arg13[%c1_73, %c0_74, %c0_75] : memref<2x8x128xf32, #tpu.memory_space<vmem>>, vector<1x8x128xf32>
      %112 = vector.shape_cast %111 : vector<1x8x128xf32> to vector<8x128xf32>
      %113 = vector.shape_cast %110 : vector<8x128xf32> to vector<1x8x128xf32>
      tpu.vector_store %arg13[%c1_73, %c0_74, %c0_75], %113 {strides = array<i32>} : memref<2x8x128xf32, #tpu.memory_space<vmem>>, vector<1x8x128xf32>,
      %c1_76 = arith.constant 1 : index
      %c0_77 = arith.constant 0 : index
      %c0_78 = arith.constant 0 : index
      %114 = vector.load %arg14[%c1_76, %c0_77, %c0_78] : memref<2x8x128xf32, #tpu.memory_space<vmem>>, vector<1x8x128xf32>
      %115 = vector.shape_cast %114 : vector<1x8x128xf32> to vector<8x128xf32>
      %116 = vector.shape_cast %108 : vector<8x128xf32> to vector<1x8x128xf32>
      tpu.vector_store %arg14[%c1_76, %c0_77, %c0_78], %116 {strides = array<i32>} : memref<2x8x128xf32, #tpu.memory_space<vmem>>, vector<1x8x128xf32>,
      %117 = arith.truncf %110 : vector<8x128xf32> to vector<8x128xbf16>
      %c0_79 = arith.constant 0 : index
      %c0_80 = arith.constant 0 : index
      %118 = vector.load %arg10[%c0_79, %c0_80] : memref<128x128xbf16, #tpu.memory_space<vmem>>, vector<128x128xbf16>
      %cst_81 = arith.constant dense<0.000000e+00> : vector<8x128xf32>
      %119 = tpu.matmul %117, %118, %cst_81 {dimension_numbers = #tpu.dot_dimension_numbers<[1], [0], [0], [1], [0, 0, 1, 1], [], []>} : vector<8x128xbf16>, vector<128x128xbf16>, vector<8x128xf32> -> vector<8x128xf32>
      %c0_82 = arith.constant 0 : index
      %c0_83 = arith.constant 0 : index
      %120 = vector.load %arg11[%c0_82, %c0_83] : memref<1x128xf32, #tpu.memory_space<vmem>>, vector<1x128xf32>
      %121 = vector.broadcast %120 : vector<1x128xf32> to vector<8x128xf32>
      %122 = arith.addf %119, %121 : vector<8x128xf32>
      %123 = arith.index_cast %arg16 : i32 to index
      %c0_84 = arith.constant 0 : index
      %c0_85 = arith.constant 0 : index
      %124 = vector.load %arg12[%123, %c0_84, %c0_85] : memref<5x8x128xf32, #tpu.memory_space<vmem>>, vector<1x8x128xf32>
      %125 = vector.shape_cast %124 : vector<1x8x128xf32> to vector<8x128xf32>
      %126 = vector.shape_cast %122 : vector<8x128xf32> to vector<1x8x128xf32>
      tpu.vector_store %arg12[%123, %c0_84, %c0_85], %126 {strides = array<i32>} : memref<5x8x128xf32, #tpu.memory_space<vmem>>, vector<1x8x128xf32>,
      %cst_86 = arith.constant dense<0xFF800000> : vector<8xf32>
      %127 = vector.multi_reduction <maximumf>, %122, %cst_86 [1] : vector<8x128xf32> to vector<8xf32>
      %128 = vector.shape_cast %127 : vector<8xf32> to vector<8x1xf32>
      %129 = vector.broadcast %128 : vector<8x1xf32> to vector<8x128xf32>
      %130 = arith.cmpf oeq, %122, %129 : vector<8x128xf32>
      %c128_i32 = arith.constant 128 : i32
      %131 = vector.broadcast %c128_i32 : i32 to vector<8x128xi32>
      %132 = arith.select %130, %14, %131 : vector<8x128xi1>, vector<8x128xi32>
      %cst_87 = arith.constant dense<2147483647> : vector<8xi32>
      %133 = vector.multi_reduction <minsi>, %132, %cst_87 [1] : vector<8x128xi32> to vector<8xi32>
      %134 = vector.shape_cast %133 : vector<8xi32> to vector<8x1xi32>
      %135 = vector.broadcast %134 : vector<8x1xi32> to vector<8x128xi32>
      %136 = arith.cmpi eq, %14, %135 : vector<8x128xi32>
      %137 = arith.extui %136 : vector<8x128xi1> to vector<8x128xi32>
      %138 = arith.sitofp %137 : vector<8x128xi32> to vector<8x128xf32>
      %139 = arith.index_cast %arg16 : i32 to index
      %140 = memref.load %arg0[%139] : memref<5xi32, #tpu.memory_space<smem>>
      %c0_i32_88 = arith.constant 0 : i32
      %141 = arith.cmpi sgt, %140, %c0_i32_88 : i32
      %142 = arith.extui %141 : i1 to i32
      %143 = arith.sitofp %142 : i32 to f32
      %144 = arith.index_cast %arg16 : i32 to index
      %c0_89 = arith.constant 0 : index
      %c0_90 = arith.constant 0 : index
      %145 = vector.load %arg5[%144, %c0_89, %c0_90] : memref<5x8x128xbf16, #tpu.memory_space<vmem>>, vector<1x8x128xbf16>
      %146 = vector.shape_cast %145 : vector<1x8x128xbf16> to vector<8x128xbf16>
      %147 = arith.extf %146 : vector<8x128xbf16> to vector<8x128xf32>
      %148 = vector.broadcast %143 : f32 to vector<8x128xf32>
      %149 = arith.mulf %148, %147 : vector<8x128xf32>
      %cst_91 = arith.constant 1.000000e+00 : f32
      %150 = arith.subf %cst_91, %143 : f32
      %151 = vector.broadcast %150 : f32 to vector<8x128xf32>
      %152 = arith.mulf %151, %138 : vector<8x128xf32>
      %153 = arith.addf %149, %152 : vector<8x128xf32>
      %154 = arith.truncf %153 : vector<8x128xf32> to vector<8x128xbf16>
      scf.yield %154 : vector<8x128xbf16>
    }
    %c4_i32_24 = arith.constant 4 : i32
    return
  }
}

</mosaic_0001>

<bundles_post_ra>
// kernel: seq2seq_forward.1
= control target key start
LH: loop header
LB: loop body
LE: loop exit
PB: predicated region body
PF: predicated region fallthrough
CT: control target
= control target key end

     0   :  { %17 = vsyncpa [#allocation8], 0  ;;  %s4267_s0 = inlined_call_operand.vmem [shape: s32[5], index: 0, kind: input, shape index: {}]   ;;  %s4268_s1 = inlined_call_operand.vmem [shape: bf16[48,128], index: 1, kind: input, shape index: {}]   ;;  %s4269_s2 = inlined_call_operand.hbm [shape: bf16[2,128,512], index: 2, kind: input, shape index: {}]   ;;  %s4270_s3 = inlined_call_operand.hbm [shape: bf16[2,128,512], index: 3, kind: input, shape index: {}]   ;;  %s4271_s4 = inlined_call_operand.vmem [shape: f32[2,1,512], index: 4, kind: input, shape index: {}]   ;;  %s4272_s5 = inlined_call_operand.vmem [shape: bf16[5,8,128], index: 5, kind: input, shape index: {}]   ;;  %s4273_s6 = inlined_call_operand.vmem [shape: bf16[128,128], index: 6, kind: input, shape index: {}]   ;;  %s4274_s7 = inlined_call_operand.hbm [shape: bf16[2,128,512], index: 7, kind: input, shape index: {}]   ;;  %s4275_s8 = inlined_call_operand.hbm [shape: bf16[2,128,512], index: 8, kind: input, shape index: {}]   ;;  %s4276_s9 = inlined_call_operand.vmem [shape: f32[2,1,512], index: 9, kind: input, shape index: {}]   ;;  %s4277_s10 = inlined_call_operand.vmem [shape: bf16[128,128], index: 10, kind: input, shape index: {}]   ;;  %s4278_s11 = inlined_call_operand.vmem [shape: f32[1,128], index: 11, kind: input, shape index: {}]   ;;  %s4279_s12 = inlined_call_operand.hbm [shape: f32[5,8,128], index: 12, kind: output, shape index: {}]  }
   0x1   :  { %18 = vsyncpa [#allocation6], 0 }
   0x2   :  { %19 = vsyncpa [#allocation11], 0 }
   0x3   :  { %20 = vsyncpa [#allocation14], 0 }
   0x4   :  { %21 = vsyncpa [#allocation7], 0  ;;  %s28_s23 = sshll.u32 %s4267_s0, 4  ;;  %s3965_s24 = smov [#allocation10]   ;;  %s29_s23 = int_to_ptr.vmem [resolvable:$true] %s28_s23 }
   0x5   :  { %s51_s25 = sshll.u32 %s3965_s24, 4  ;;  %s52_s25 = int_to_ptr.vmem [resolvable:$true] %s51_s25 }
   0x6   :  { %s3827_s26 = scalar_lea.vmem %s52_s25, 8192  ;;  %p3832_p1 = scmp.lt.s32.totalorder %s52_s25, %s52_s25 }
   0x7   :  { %p3828_p0 = scmp.ne.s32.totalorder %s52_s25, %s3827_s26  ;;  %p3833_p2 = scmp.lt.s32.totalorder %s3827_s26, %s3827_s26 }
   0x9   :  { %p3834_p3 = por %p3833_p2, %p3832_p1 }
   0xb   :  { %p3835_p4 = pnand %p3834_p3, %p3828_p0 }
   0xd   :  { %3838 = shalt.err (!%p3835_p4)
}
   0xe   :  { %s3966_s27 = smov 256   ;;  %s3967_s28 = smov 16  }
   0xf   :  { %57 = dma.hbm_to_vmem [thread:$0]  %s4270_s3, 8192, %s52_s25, [#allocation11], %s3966_s27, %s3966_s27, %s3967_s28  }
  0x10   :  { %s3839_s0 = scalar_lea.vmem %s29_s23, 16  ;;  %p3844_p6 = scmp.lt.s32.totalorder %s29_s23, %s29_s23 }
  0x11   :  { %p3840_p5 = scmp.ne.s32.totalorder %s29_s23, %s3839_s0  ;;  %p3845_p7 = scmp.lt.s32.totalorder %s3839_s0, %s3839_s0 }
  0x13   :  { %p3846_p8 = por %p3845_p7, %p3844_p6 }
  0x15   :  { %p3847_p9 = pnand %p3846_p8, %p3840_p5 }
  0x17   :  { %3850 = shalt.err (!%p3847_p9)
}
  0x18   :  { %s3968_s13 = smov [#allocation5]   ;;  %s3969_s14 = smov [#allocation9]  }
  0x19   :  { %31 = dma.vmem_to_smem %s29_s23, 16, %s3968_s13, [#allocation8]  }
  0x1a   :  { %s39_s15 = sshll.u32 %s3969_s14, 4  ;;  %s3970_s16 = smov [#allocation12]   ;;  %s40_s15 = int_to_ptr.vmem [resolvable:$true] %s39_s15 }
  0x1b   :  { %s69_s17 = sshll.u32 %s3970_s16, 4  ;;  %s3859_s18 = scalar_lea.vmem %s40_s15, 8192  ;;  %s70_s17 = int_to_ptr.vmem [resolvable:$true] %s69_s17 }
  0x1c   :  { %p3860_p10 = scmp.ne.s32.totalorder %s40_s15, %s3859_s18  ;;  %p3864_p11 = scmp.lt.s32.totalorder %s40_s15, %s40_s15 }
  0x1d   :  { %p3865_p12 = scmp.lt.s32.totalorder %s3859_s18, %s3859_s18 }
  0x1f   :  { %p3866_p13 = por %p3865_p12, %p3864_p11 }
  0x21   :  { %p3867_p0 = pnand %p3866_p13, %p3860_p10 }
  0x23   :  { %3870 = shalt.err (!%p3867_p0)
}
  0x24   :  { %45 = dma.hbm_to_vmem [thread:$0]  %s4269_s2, 8192, %s40_s15, [#allocation6], %s3966_s27, %s3966_s27, %s3967_s28  }
  0x25   :  { %s3879_s20 = scalar_lea.vmem %s70_s17, 8192  ;;  %p3884_p2 = scmp.lt.s32.totalorder %s70_s17, %s70_s17 }
  0x26   :  { %p3880_p1 = scmp.ne.s32.totalorder %s70_s17, %s3879_s20  ;;  %p3885_p3 = scmp.lt.s32.totalorder %s3879_s20, %s3879_s20 }
  0x28   :  { %p3886_p4 = por %p3885_p3, %p3884_p2 }
  0x2a   :  { %p3887_p5 = pnand %p3886_p4, %p3880_p1 }
  0x2c   :  { %3890 = shalt.err (!%p3887_p5)
}
  0x2d   :  { %75 = dma.hbm_to_vmem [thread:$0]  %s4274_s7, 8192, %s70_s17, [#allocation11], %s3966_s27, %s3966_s27, %s3967_s28  }
  0x2e   :  { %s3971_s23 = smov [#allocation13]  }
  0x2f   :  { %s81_s24 = sshll.u32 %s3971_s23, 4  ;;  %s82_s24 = int_to_ptr.vmem [resolvable:$true] %s81_s24 }
  0x30   :  { %s3899_s25 = scalar_lea.vmem %s82_s24, 8192  ;;  %p3904_p7 = scmp.lt.s32.totalorder %s82_s24, %s82_s24 }
  0x31   :  { %p3900_p6 = scmp.ne.s32.totalorder %s82_s24, %s3899_s25  ;;  %p3905_p8 = scmp.lt.s32.totalorder %s3899_s25, %s3899_s25 }
  0x33   :  { %p3906_p9 = por %p3905_p8, %p3904_p7 }
  0x35   :  { %p3907_p10 = pnand %p3906_p9, %p3900_p6 }
  0x37   :  { %3910 = shalt.err (!%p3907_p10)
}
  0x38   :  { %87 = dma.hbm_to_vmem [thread:$0]  %s4275_s8, 8192, %s82_s24, [#allocation14], %s3966_s27, %s3966_s27, %s3967_s28  }
  0x39   :  { %3943 = dma.done.wait [#allocation8], 16  }
  0x3a   :  { %3944 = vsyncadd [#allocation8], 4294967280 }
  0x3b   :  { %3945 = dma.done.wait [#allocation6], 8192  }
  0x3c   :  { %3946 = vsyncadd [#allocation6], 4294959104 }
  0x3d   :  { %3947 = dma.done.wait [#allocation11], 16384  }
  0x3e   :  { %3948 = vsyncadd [#allocation11], 4294950912 }
  0x3f   :  { %3949 = dma.done.wait [#allocation14], 8192  }
  0x40   :  { %3950 = vsyncadd [#allocation14], 4294959104 }
  0x41   :  { %109 = sfence }
  0x42   :  { %v3352_v0 = vld [vmem:[#allocation9 + $0xe4] ss:$16 sps:$4 sm:$0xff]   ;;  %v3972_v1 = vmov 0.0   ;;  %v3354_v2 = vld [vmem:[#allocation9 + $0xec] ss:$16 sps:$4 sm:$0xff]   ;;  %v3973_v3 = vmov 0  }
  0x43   :  { %111 = vst [vmem:[#allocation2] sm:$0xff] %v3972_v1  ;;  %112 = vst [vmem:[#allocation2 + $0x8] sm:$0xff] %v3972_v1  ;;  %363 = vmatprep.mubr.bf16.mxu0 %v3973_v3  ;;  %426 = vmatprep.mubr.bf16.mxu1 %v3973_v3  ;;  %v3356_v4 = vld [vmem:[#allocation9 + $0xe0] ss:$16 sps:$4 sm:$0xff]   ;;  %v3357_v5 = vld [vmem:[#allocation9 + $0xe8] ss:$16 sps:$4 sm:$0xff]  }
  0x44   :  { %113 = vst [vmem:[#allocation3 + $0x8] sm:$0xff] %v3972_v1  ;;  %114 = vst [vmem:[#allocation3] sm:$0xff] %v3972_v1  ;;  %331 = vmatprep.subr.bf16.mxu0 %v3352_v0  ;;  %394 = vmatprep.subr.bf16.mxu1 %v3354_v2  ;;  %v3358_v6 = vld [vmem:[#allocation9 + $0xc4] ss:$16 sps:$4 sm:$0xff]   ;;  %v3360_v7 = vld [vmem:[#allocation9 + $0xcc] ss:$16 sps:$4 sm:$0xff]  }
  0x45   :  { %332 = vmatpush1.bf16.msra.mxu0 %v3356_v4  ;;  %395 = vmatpush1.bf16.msra.mxu1 %v3357_v5  ;;  %v3362_v8 = vld [vmem:[#allocation9 + $0xc0] ss:$16 sps:$4 sm:$0xff]   ;;  %v3363_v9 = vld [vmem:[#allocation9 + $0xc8] ss:$16 sps:$4 sm:$0xff]   ;;  %v3364_v10 = vld [vmem:[#allocation9 + $0xa4] ss:$16 sps:$4 sm:$0xff]  }
  0x46   :  { %333 = vmatprep.subr.bf16.mxu0 %v3358_v6  ;;  %396 = vmatprep.subr.bf16.mxu1 %v3360_v7  ;;  %v3366_v11 = vld [vmem:[#allocation9 + $0xac] ss:$16 sps:$4 sm:$0xff]   ;;  %v3368_v12 = vld [vmem:[#allocation9 + $0xa0] ss:$16 sps:$4 sm:$0xff]   ;;  %v3369_v13 = vld [vmem:[#allocation9 + $0xa8] ss:$16 sps:$4 sm:$0xff]  }
  0x47   :  { %v3370_v14 = vld [vmem:[#allocation9 + $0x84] ss:$16 sps:$4 sm:$0xff]   ;;  %v3372_v15 = vld [vmem:[#allocation9 + $0x8c] ss:$16 sps:$4 sm:$0xff]   ;;  %v3374_v16 = vld [vmem:[#allocation9 + $0x80] ss:$16 sps:$4 sm:$0xff]  }
  0x48   :  { %v3375_v17 = vld [vmem:[#allocation9 + $0x88] ss:$16 sps:$4 sm:$0xff]   ;;  %v3376_v18 = vld [vmem:[#allocation9 + $0x64] ss:$16 sps:$4 sm:$0xff]   ;;  %v3378_v19 = vld [vmem:[#allocation9 + $0x6c] ss:$16 sps:$4 sm:$0xff]  }
  0x49   :  { %334 = vmatpush1.bf16.msra.mxu0 %v3362_v8  ;;  %397 = vmatpush1.bf16.msra.mxu1 %v3363_v9  ;;  %v3380_v20 = vld [vmem:[#allocation9 + $0x60] ss:$16 sps:$4 sm:$0xff]   ;;  %v3381_v21 = vld [vmem:[#allocation9 + $0x68] ss:$16 sps:$4 sm:$0xff]   ;;  %v3382_v22 = vld [vmem:[#allocation9 + $0x44] ss:$16 sps:$4 sm:$0xff]  }
  0x4a   :  { %335 = vmatprep.subr.bf16.mxu0 %v3364_v10  ;;  %398 = vmatprep.subr.bf16.mxu1 %v3366_v11  ;;  %v3384_v23 = vld [vmem:[#allocation9 + $0x4c] ss:$16 sps:$4 sm:$0xff]   ;;  %v3386_v24 = vld [vmem:[#allocation9 + $0x40] ss:$16 sps:$4 sm:$0xff]   ;;  %v3387_v25 = vld [vmem:[#allocation9 + $0x48] ss:$16 sps:$4 sm:$0xff]  }
  0x4b   :  { %v3388_v26 = vld [vmem:[#allocation9 + $0x24] ss:$16 sps:$4 sm:$0xff]   ;;  %v3390_v27 = vld [vmem:[#allocation9 + $0x2c] ss:$16 sps:$4 sm:$0xff]   ;;  %v3392_v28 = vld [vmem:[#allocation9 + $0x20] ss:$16 sps:$4 sm:$0xff]  }
  0x4c   :  { %v3393_v29 = vld [vmem:[#allocation9 + $0x28] ss:$16 sps:$4 sm:$0xff]   ;;  %v3394_v30 = vld [vmem:[#allocation9 + $0x4] ss:$16 sps:$4 sm:$0xff]   ;;  %v3396_v31 = vld [vmem:[#allocation9 + $0xc] ss:$16 sps:$4 sm:$0xff]  }
  0x4d   :  { %336 = vmatpush1.bf16.msra.mxu0 %v3368_v12  ;;  %399 = vmatpush1.bf16.msra.mxu1 %v3369_v13  ;;  %v3398_v32 = vld [vmem:[#allocation9] ss:$16 sps:$4 sm:$0xff]   ;;  %v3399_v33 = vld [vmem:[#allocation9 + $0x8] ss:$16 sps:$4 sm:$0xff]  }
  0x4e   :  { %337 = vmatprep.subr.bf16.mxu0 %v3370_v14  ;;  %400 = vmatprep.subr.bf16.mxu1 %v3372_v15  ;;  %v3400_v34 = vld [vmem:[%s4268_s1] sm:$0xff]   ;;  %v3401_v35 = vld [vmem:[%s4268_s1 + $0x8] sm:$0xff]   ;;  %v3402_v36 = vld [vmem:[%s4268_s1 + $0x10] sm:$0xff]   ;;  %s4092_s1 = smov 0  }
  0x51   :  { %338 = vmatpush1.bf16.msra.mxu0 %v3374_v16  ;;  %401 = vmatpush1.bf16.msra.mxu1 %v3375_v17 }
  0x52   :  { %339 = vmatprep.subr.bf16.mxu0 %v3376_v18  ;;  %402 = vmatprep.subr.bf16.mxu1 %v3378_v19 }
  0x55   :  { %340 = vmatpush1.bf16.msra.mxu0 %v3380_v20  ;;  %403 = vmatpush1.bf16.msra.mxu1 %v3381_v21 }
  0x56   :  { %341 = vmatprep.subr.bf16.mxu0 %v3382_v22  ;;  %404 = vmatprep.subr.bf16.mxu1 %v3384_v23 }
  0x59   :  { %342 = vmatpush1.bf16.msra.mxu0 %v3386_v24  ;;  %405 = vmatpush1.bf16.msra.mxu1 %v3387_v25 }
  0x5a   :  { %343 = vmatprep.subr.bf16.mxu0 %v3388_v26  ;;  %406 = vmatprep.subr.bf16.mxu1 %v3390_v27 }
  0x5d   :  { %344 = vmatpush1.bf16.msra.mxu0 %v3392_v28  ;;  %407 = vmatpush1.bf16.msra.mxu1 %v3393_v29 }
  0x5e   :  { %345 = vmatprep.subr.bf16.mxu0 %v3394_v30  ;;  %408 = vmatprep.subr.bf16.mxu1 %v3396_v31 }
  0x61   :  { %346 = vmatpush1.bf16.msra.mxu0 %v3398_v32  ;;  %409 = vmatpush1.bf16.msra.mxu1 %v3399_v33 }
  0x64   :  { %364 = vmatmul.mubr.bf16.vlgmr.msra.gmra.mxu0 %v3400_v34  ;;  %427 = vmatmul.mubr.bf16.vlgmr.msra.gmra.mxu1 %v3400_v34 }
  0x65   :  { %373 = vmatprep.mubr.bf16.mxu0 %v3973_v3  ;;  %436 = vmatprep.mubr.bf16.mxu1 %v3973_v3 }
  0x6c   :  { %374 = vmatmul.mubr.bf16.gmra.mxu0 %v3401_v35  ;;  %437 = vmatmul.mubr.bf16.gmra.mxu1 %v3401_v35 }
  0x6d   :  { %383 = vmatprep.mubr.bf16.mxu0 %v3973_v3  ;;  %446 = vmatprep.mubr.bf16.mxu1 %v3973_v3 }
  0x74   :  { %384 = vmatmul.mubr.bf16.gmra.mxu0 %v3402_v36  ;;  %447 = vmatmul.mubr.bf16.gmra.mxu1 %v3402_v36 }
 0x124   :  { %v365_v37 = vpop.f32.mrf.mxu0  ;;  %v428_v38 = vpop.f32.mrf.mxu1 }
 0x125   :  { %457 = vst [vmem:[#allocation4] sm:$0xff] %v365_v37  ;;  %459 = vst [vmem:[#allocation4 + $0x10] sm:$0xff] %v428_v38 }
 0x126   :  { %v367_v39 = vpop.f32.mrf.mxu0  ;;  %v430_v40 = vpop.f32.mrf.mxu1 }
 0x127   :  { %458 = vst [vmem:[#allocation4 + $0x8] sm:$0xff] %v367_v39  ;;  %460 = vst [vmem:[#allocation4 + $0x18] sm:$0xff] %v430_v40 }
 0x128   :  { %v369_v41 = vpop.f32.mrf.mxu0  ;;  %v432_v42 = vpop.f32.mrf.mxu1 }
 0x129   :  { %461 = vst [vmem:[#allocation4 + $0x20] sm:$0xff] %v369_v41  ;;  %463 = vst [vmem:[#allocation4 + $0x30] sm:$0xff] %v432_v42 }
 0x12a   :  { %v371_v43 = vpop.f32.mrf.mxu0  ;;  %v434_v44 = vpop.f32.mrf.mxu1 }
 0x12b   :  { %462 = vst [vmem:[#allocation4 + $0x28] sm:$0xff] %v371_v43  ;;  %464 = vst [vmem:[#allocation4 + $0x38] sm:$0xff] %v434_v44 }
 0x12c   :  { %v375_v45 = vpop.f32.mrf.mxu0  ;;  %v438_v46 = vpop.f32.mrf.mxu1 }
 0x12d   :  { %465 = vst [vmem:[#allocation4 + $0x40] sm:$0xff] %v375_v45  ;;  %467 = vst [vmem:[#allocation4 + $0x50] sm:$0xff] %v438_v46 }
 0x12e   :  { %v377_v47 = vpop.f32.mrf.mxu0  ;;  %v440_v48 = vpop.f32.mrf.mxu1 }
 0x12f   :  { %466 = vst [vmem:[#allocation4 + $0x48] sm:$0xff] %v377_v47  ;;  %468 = vst [vmem:[#allocation4 + $0x58] sm:$0xff] %v440_v48 }
 0x130   :  { %v379_v49 = vpop.f32.mrf.mxu0  ;;  %v442_v50 = vpop.f32.mrf.mxu1 }
 0x131   :  { %469 = vst [vmem:[#allocation4 + $0x60] sm:$0xff] %v379_v49  ;;  %471 = vst [vmem:[#allocation4 + $0x70] sm:$0xff] %v442_v50 }
 0x132   :  { %v381_v51 = vpop.f32.mrf.mxu0  ;;  %v444_v52 = vpop.f32.mrf.mxu1 }
 0x133   :  { %470 = vst [vmem:[#allocation4 + $0x68] sm:$0xff] %v381_v51  ;;  %472 = vst [vmem:[#allocation4 + $0x78] sm:$0xff] %v444_v52 }
 0x134   :  { %v385_v53 = vpop.f32.mrf.mxu0  ;;  %v448_v54 = vpop.f32.mrf.mxu1 }
 0x135   :  { %473 = vst [vmem:[#allocation4 + $0x80] sm:$0xff] %v385_v53  ;;  %475 = vst [vmem:[#allocation4 + $0x90] sm:$0xff] %v448_v54 }
 0x136   :  { %v387_v55 = vpop.f32.mrf.mxu0  ;;  %v450_v56 = vpop.f32.mrf.mxu1 }
 0x137   :  { %474 = vst [vmem:[#allocation4 + $0x88] sm:$0xff] %v387_v55  ;;  %476 = vst [vmem:[#allocation4 + $0x98] sm:$0xff] %v450_v56 }
 0x138   :  { %v389_v57 = vpop.f32.mrf.mxu0  ;;  %v452_v58 = vpop.f32.mrf.mxu1 }
 0x139   :  { %477 = vst [vmem:[#allocation4 + $0xa0] sm:$0xff] %v389_v57  ;;  %479 = vst [vmem:[#allocation4 + $0xb0] sm:$0xff] %v452_v58 }
 0x13a   :  { %v391_v59 = vpop.f32.mrf.mxu0  ;;  %v454_v60 = vpop.f32.mrf.mxu1 }
 0x13b   :  { %478 = vst [vmem:[#allocation4 + $0xa8] sm:$0xff] %v391_v59  ;;  %480 = vst [vmem:[#allocation4 + $0xb8] sm:$0xff] %v454_v60 }
 0x13c LB: > { %v3403_v61 = vld [vmem:[#allocation10 + $0xe4] ss:$16 sps:$4 sm:$0xff]   ;;  %v3405_v62 = vld [vmem:[#allocation10 + $0xe0] ss:$16 sps:$4 sm:$0xff]   ;;  %v3974_v63 = vmov 0   ;;  %s2992_s0 = sshll.u32 %s3955_s1, 3  ;;  %s3955_s1 = sphi %s4092_s1, %s486_s1  }
 0x13d   : > { %723 = vmatprep.mubr.bf16.mxu0 %v3974_v63  ;;  %764 = vmatprep.mubr.bf16.mxu1 %v3974_v63  ;;  %v3406_v0 = vld [vmem:[#allocation10 + $0xc4] ss:$16 sps:$4 sm:$0xff]   ;;  %v3408_v2 = vld [vmem:[#allocation10 + $0xc0] ss:$16 sps:$4 sm:$0xff]   ;;  %v3414_v4 = vld [vmem:[#allocation10 + $0xec] ss:$16 sps:$4 sm:$0xff]  }
 0x13e   : > { %691 = vmatprep.subr.bf16.mxu0 %v3403_v61  ;;  %v3409_v3 = vld [vmem:[#allocation10 + $0xa4] ss:$16 sps:$4 sm:$0xff]   ;;  %v3417_v5 = vld [vmem:[#allocation10 + $0xe8] ss:$16 sps:$4 sm:$0xff]   ;;  %v3411_v6 = vld [vmem:[#allocation10 + $0xa0] ss:$16 sps:$4 sm:$0xff]   ;;  %732 = vmatprep.subr.bf16.mxu1 %v3414_v4 }
 0x13f   : > { %692 = vmatpush1.bf16.msra.mxu0 %v3405_v62  ;;  %v3412_v7 = vld [vmem:[#allocation10 + $0x84] ss:$16 sps:$4 sm:$0xff]   ;;  %733 = vmatpush1.bf16.msra.mxu1 %v3417_v5  ;;  %v3420_v8 = vld [vmem:[#allocation10 + $0xcc] ss:$16 sps:$4 sm:$0xff]   ;;  %v3423_v9 = vld [vmem:[#allocation10 + $0xc8] ss:$16 sps:$4 sm:$0xff]  }
 0x140   : > { %693 = vmatprep.subr.bf16.mxu0 %v3406_v0  ;;  %734 = vmatprep.subr.bf16.mxu1 %v3420_v8  ;;  %v3416_v10 = vld [vmem:[#allocation10 + $0x80] ss:$16 sps:$4 sm:$0xff]   ;;  %v3418_v11 = vld [vmem:[#allocation10 + $0x64] ss:$16 sps:$4 sm:$0xff]   ;;  %v3426_v12 = vld [vmem:[#allocation10 + $0xac] ss:$16 sps:$4 sm:$0xff]  }
 0x141   : > { %v3429_v13 = vld [vmem:[#allocation10 + $0xa8] ss:$16 sps:$4 sm:$0xff]   ;;  %v3432_v14 = vld [vmem:[#allocation10 + $0x8c] ss:$16 sps:$4 sm:$0xff]   ;;  %v3422_v15 = vld [vmem:[#allocation10 + $0x60] ss:$16 sps:$4 sm:$0xff]  }
 0x142   : > { %v3424_v16 = vld [vmem:[#allocation10 + $0x44] ss:$16 sps:$4 sm:$0xff]   ;;  %v3435_v17 = vld [vmem:[#allocation10 + $0x88] ss:$16 sps:$4 sm:$0xff]   ;;  %v3438_v18 = vld [vmem:[#allocation10 + $0x6c] ss:$16 sps:$4 sm:$0xff]  }
 0x143   : > { %694 = vmatpush1.bf16.msra.mxu0 %v3408_v2  ;;  %735 = vmatpush1.bf16.msra.mxu1 %v3423_v9  ;;  %v3428_v19 = vld [vmem:[#allocation10 + $0x40] ss:$16 sps:$4 sm:$0xff]   ;;  %v3430_v20 = vld [vmem:[#allocation10 + $0x24] ss:$16 sps:$4 sm:$0xff]   ;;  %v3441_v21 = vld [vmem:[#allocation10 + $0x68] ss:$16 sps:$4 sm:$0xff]  }
 0x144   : > { %695 = vmatprep.subr.bf16.mxu0 %v3409_v3  ;;  %736 = vmatprep.subr.bf16.mxu1 %v3426_v12  ;;  %v3442_v22 = vld [vmem:[#allocation10 + $0x4c] ss:$16 sps:$4 sm:$0xff]   ;;  %v3434_v23 = vld [vmem:[#allocation10 + $0x20] ss:$16 sps:$4 sm:$0xff]   ;;  %v3436_v24 = vld [vmem:[#allocation10 + $0x4] ss:$16 sps:$4 sm:$0xff]  }
 0x145   : > { %v3444_v25 = vld [vmem:[#allocation10 + $0x48] ss:$16 sps:$4 sm:$0xff]   ;;  %v3440_v26 = vld [vmem:[#allocation10] ss:$16 sps:$4 sm:$0xff]   ;;  %v3445_v28 = vld [vmem:[#allocation10 + $0x2c] ss:$16 sps:$4 sm:$0xff]  }
 0x146   : > { %v497_v27 = vld [vmem:[#allocation2] sm:$0xff]  ;;  %v3447_v29 = vld [vmem:[#allocation10 + $0x28] ss:$16 sps:$4 sm:$0xff]   ;;  %v3448_v31 = vld [vmem:[#allocation10 + $0xc] ss:$16 sps:$4 sm:$0xff]   ;;  %s488_s13 = sshra.s32 %s2992_s0, 3 }
 0x147   : > { %696 = vmatpush1.bf16.msra.mxu0 %v3411_v6  ;;  %737 = vmatpush1.bf16.msra.mxu1 %v3429_v13  ;;  %v3453_v30 = vld [vmem:[#allocation10 + $0x1e4] ss:$16 sps:$4 sm:$0xff]   ;;  %v3451_v32 = vld [vmem:[#allocation10 + $0x1e0] ss:$16 sps:$4 sm:$0xff]   ;;  %v498_v33 = vpack.c.bf16 %v497_v27, %v497_v27  ;;  %v3450_v34 = vld [vmem:[#allocation10 + $0x8] ss:$16 sps:$4 sm:$0xff]  }
 0x148   : > { %697 = vmatprep.subr.bf16.mxu0 %v3412_v7  ;;  %738 = vmatprep.subr.bf16.mxu1 %v3432_v14  ;;  %v3456_v35 = vld [vmem:[#allocation10 + $0x1c4] ss:$16 sps:$4 sm:$0xff]   ;;  %v3459_v36 = vld [vmem:[#allocation10 + $0x1ec] ss:$16 sps:$4 sm:$0xff]   ;;  %v3454_v37 = vld [vmem:[#allocation10 + $0x1c0] ss:$16 sps:$4 sm:$0xff]  }
 0x149   : > { %v3457_v38 = vld [vmem:[#allocation10 + $0x1e8] ss:$16 sps:$4 sm:$0xff]   ;;  %v3462_v39 = vld [vmem:[#allocation10 + $0x1a4] ss:$16 sps:$4 sm:$0xff]   ;;  %v3460_v40 = vld [vmem:[#allocation10 + $0x1a0] ss:$16 sps:$4 sm:$0xff]  }
 0x14a   : > { %v3465_v41 = vld [vmem:[#allocation10 + $0x1cc] ss:$16 sps:$4 sm:$0xff]   ;;  %v3463_v42 = vld [vmem:[#allocation10 + $0x1c8] ss:$16 sps:$4 sm:$0xff]   ;;  %v3468_v43 = vld [vmem:[#allocation10 + $0x184] ss:$16 sps:$4 sm:$0xff]  }
 0x14b   : > { %698 = vmatpush1.bf16.msra.mxu0 %v3416_v10  ;;  %739 = vmatpush1.bf16.msra.mxu1 %v3435_v17  ;;  %v3466_v44 = vld [vmem:[#allocation10 + $0x180] ss:$16 sps:$4 sm:$0xff]   ;;  %v3471_v45 = vld [vmem:[#allocation10 + $0x1ac] ss:$16 sps:$4 sm:$0xff]   ;;  %v3469_v46 = vld [vmem:[#allocation10 + $0x1a8] ss:$16 sps:$4 sm:$0xff]  }
 0x14c   : > { %699 = vmatprep.subr.bf16.mxu0 %v3418_v11  ;;  %740 = vmatprep.subr.bf16.mxu1 %v3438_v18  ;;  %v3474_v47 = vld [vmem:[#allocation10 + $0x164] ss:$16 sps:$4 sm:$0xff]   ;;  %v3472_v48 = vld [vmem:[#allocation10 + $0x160] ss:$16 sps:$4 sm:$0xff]   ;;  %v3477_v49 = vld [vmem:[#allocation10 + $0x18c] ss:$16 sps:$4 sm:$0xff]  }
 0x14d   : > { %v3475_v50 = vld [vmem:[#allocation10 + $0x188] ss:$16 sps:$4 sm:$0xff]   ;;  %v3480_v51 = vld [vmem:[#allocation10 + $0x144] ss:$16 sps:$4 sm:$0xff]   ;;  %v3478_v52 = vld [vmem:[#allocation10 + $0x140] ss:$16 sps:$4 sm:$0xff]  }
 0x14e   : > { %v3483_v53 = vld [vmem:[#allocation10 + $0x16c] ss:$16 sps:$4 sm:$0xff]   ;;  %v3481_v54 = vld [vmem:[#allocation10 + $0x168] ss:$16 sps:$4 sm:$0xff]   ;;  %v3486_v55 = vld [vmem:[#allocation10 + $0x124] ss:$16 sps:$4 sm:$0xff]  }
 0x14f   : > { %700 = vmatpush1.bf16.msra.mxu0 %v3422_v15  ;;  %741 = vmatpush1.bf16.msra.mxu1 %v3441_v21  ;;  %v3484_v56 = vld [vmem:[#allocation10 + $0x120] ss:$16 sps:$4 sm:$0xff]   ;;  %v3489_v57 = vld [vmem:[#allocation10 + $0x14c] ss:$16 sps:$4 sm:$0xff]   ;;  %v3487_v58 = vld [vmem:[#allocation10 + $0x148] ss:$16 sps:$4 sm:$0xff]  }
 0x150   : > { %701 = vmatprep.subr.bf16.mxu0 %v3424_v16  ;;  %742 = vmatprep.subr.bf16.mxu1 %v3442_v22  ;;  %v3492_v59 = vld [vmem:[#allocation10 + $0x104] ss:$16 sps:$4 sm:$0xff]   ;;  %v3490_v60 = vld [vmem:[#allocation10 + $0x100] ss:$16 sps:$4 sm:$0xff]   ;;  %v3495_v61 = vld [vmem:[#allocation10 + $0x12c] ss:$16 sps:$4 sm:$0xff]  }
 0x151   : > { %v3493_v62 = vld [vmem:[#allocation10 + $0x128] ss:$16 sps:$4 sm:$0xff]   ;;  %v3498_v3 = vld [vmem:[#allocation10 + $0x10c] ss:$16 sps:$4 sm:$0xff]   ;;  %v3501_v5 = vld [vmem:[#allocation9 + $0x1e4] ss:$16 sps:$4 sm:$0xff]  }
 0x152   : > { %v865_v0 = vld [vmem:[#allocation2 + $0x8] sm:$0xff]  ;;  %v3499_v7 = vld [vmem:[#allocation9 + $0x1e0] ss:$16 sps:$4 sm:$0xff]   ;;  %v3507_v9 = vld [vmem:[#allocation9 + $0x1c4] ss:$16 sps:$4 sm:$0xff]   ;;  %s3253_s14 = sshll.u32 %s488_s13, 5 }
 0x153   : > { %702 = vmatpush1.bf16.msra.mxu0 %v3428_v19  ;;  %743 = vmatpush1.bf16.msra.mxu1 %v3444_v25  ;;  %v866_v2 = vpack.c.bf16 %v865_v0, %v865_v0  ;;  %v3496_v4 = vld [vmem:[#allocation10 + $0x108] ss:$16 sps:$4 sm:$0xff]   ;;  %v3504_v6 = vld [vmem:[#allocation9 + $0x1ec] ss:$16 sps:$4 sm:$0xff]   ;;  %v3505_v11 = vld [vmem:[#allocation9 + $0x1c0] ss:$16 sps:$4 sm:$0xff]  }
 0x154   : > { %703 = vmatprep.subr.bf16.mxu0 %v3430_v20  ;;  %744 = vmatprep.subr.bf16.mxu1 %v3445_v28  ;;  %v3502_v8 = vld [vmem:[#allocation9 + $0x1e8] ss:$16 sps:$4 sm:$0xff]   ;;  %v3510_v10 = vld [vmem:[#allocation9 + $0x1cc] ss:$16 sps:$4 sm:$0xff]   ;;  %v3513_v13 = vld [vmem:[#allocation9 + $0x1a4] ss:$16 sps:$4 sm:$0xff]  }
 0x155   : > { %v3508_v12 = vld [vmem:[#allocation9 + $0x1c8] ss:$16 sps:$4 sm:$0xff]   ;;  %v3516_v14 = vld [vmem:[#allocation9 + $0x1ac] ss:$16 sps:$4 sm:$0xff]   ;;  %v3511_v15 = vld [vmem:[#allocation9 + $0x1a0] ss:$16 sps:$4 sm:$0xff]  }
 0x156   : > { %v3514_v16 = vld [vmem:[#allocation9 + $0x1a8] ss:$16 sps:$4 sm:$0xff]   ;;  %v3519_v17 = vld [vmem:[#allocation9 + $0x184] ss:$16 sps:$4 sm:$0xff]   ;;  %v3522_v18 = vld [vmem:[#allocation9 + $0x18c] ss:$16 sps:$4 sm:$0xff]  }
 0x157   : > { %704 = vmatpush1.bf16.msra.mxu0 %v3434_v23  ;;  %745 = vmatpush1.bf16.msra.mxu1 %v3447_v29  ;;  %v3517_v19 = vld [vmem:[#allocation9 + $0x180] ss:$16 sps:$4 sm:$0xff]   ;;  %v3520_v20 = vld [vmem:[#allocation9 + $0x188] ss:$16 sps:$4 sm:$0xff]   ;;  %v3525_v21 = vld [vmem:[#allocation9 + $0x164] ss:$16 sps:$4 sm:$0xff]  }
 0x158   : > { %705 = vmatprep.subr.bf16.mxu0 %v3436_v24  ;;  %746 = vmatprep.subr.bf16.mxu1 %v3448_v31  ;;  %v3526_v22 = vld [vmem:[#allocation9 + $0x168] ss:$16 sps:$4 sm:$0xff]   ;;  %v3528_v23 = vld [vmem:[#allocation9 + $0x16c] ss:$16 sps:$4 sm:$0xff]   ;;  %v3531_v24 = vld [vmem:[#allocation9 + $0x144] ss:$16 sps:$4 sm:$0xff]  }
 0x159   : > { %v3534_v25 = vld [vmem:[#allocation9 + $0x14c] ss:$16 sps:$4 sm:$0xff]   ;;  %v3532_v27 = vld [vmem:[#allocation9 + $0x148] ss:$16 sps:$4 sm:$0xff]   ;;  %v3537_v28 = vld [vmem:[#allocation9 + $0x124] ss:$16 sps:$4 sm:$0xff]  }
 0x15a   : > { %v3540_v29 = vld [vmem:[#allocation9 + $0x12c] ss:$16 sps:$4 sm:$0xff]   ;;  %v3538_v31 = vld [vmem:[#allocation9 + $0x128] ss:$16 sps:$4 sm:$0xff]   ;;  %s492_s17 = scalar_lea.vmem [#allocation4], %s3253_s14  ;;  %s486_s1 = sadd.s32 1, %s3955_s1  }
 0x15b   : > { %706 = vmatpush1.bf16.msra.mxu0 %v3440_v26  ;;  %747 = vmatpush1.bf16.msra.mxu1 %v3450_v34  ;;  %v3529_v26 = vld [vmem:[#allocation9 + $0x140] ss:$16 sps:$4 sm:$0xff]   ;;  %p483_p11 = scmp.ge.s32.totalorder %s486_s1, 6  }
 0x15c   : > { %1060 = vmatprep.subr.bf16.mxu0 %v3453_v30  ;;  %1101 = vmatprep.subr.bf16.mxu1 %v3459_v36  ;;  %v3535_v30 = vld [vmem:[#allocation9 + $0x120] ss:$16 sps:$4 sm:$0xff]   ;;  %v779_v36 = vlaneseq  ;;  %1439 = vst [vmem:[#allocation15] sm:$0xff] (%p483_p11), %v3972_v1  ;;  %s4139_s21 = smov (%p483_p11), 1  }
 0x15d   : > { %v3541_v34 = vld [vmem:[#allocation9 + $0x100] ss:$16 sps:$4 sm:$0xff]  }
 0x15e   : > { %724 = vmatmul.mubr.bf16.vlgmr.msra.gmra.mxu0 %v498_v33  ;;  %765 = vmatmul.mubr.bf16.vlgmr.msra.gmra.mxu1 %v498_v33  ;;  %v3546_v33 = vld [vmem:[#allocation9 + $0x10c] ss:$16 sps:$4 sm:$0xff]  }
 0x15f   : > { %1061 = vmatpush1.bf16.msra.mxu0 %v3451_v32  ;;  %1092 = vmatprep.mubr.bf16.mxu0 %v3974_v63  ;;  %v3543_v32 = vld [vmem:[#allocation9 + $0x104] ss:$16 sps:$4 sm:$0xff]  }
 0x160   : > { %1062 = vmatprep.subr.bf16.mxu0 %v3456_v35  ;;  %1102 = vmatpush1.bf16.msra.mxu1 %v3457_v38  ;;  %v3544_v35 = vld [vmem:[#allocation9 + $0x108] ss:$16 sps:$4 sm:$0xff]  }
 0x161   : > { %1133 = vmatprep.mubr.bf16.mxu1 %v3974_v63  ;;  %1103 = vmatprep.subr.bf16.mxu1 %v3465_v41  ;;  %v493_v41 = vld [vmem:[%s492_s17] sm:$0xff] }
 0x163   : > { %1063 = vmatpush1.bf16.msra.mxu0 %v3454_v37  ;;  %v780_v37 = vshrl.u32 %v779_v36, 7 }
 0x164   : > { %1064 = vmatprep.subr.bf16.mxu0 %v3462_v39  ;;  %1104 = vmatpush1.bf16.msra.mxu1 %v3463_v42  ;;  %v777_v39 = vld [vmem:[%s4271_s4] sm:$0xf] }
 0x165   : > { %1105 = vmatprep.subr.bf16.mxu1 %v3471_v45  ;;  %v4105_v38 = vsub.s32 0, %v780_v37 }
 0x167   : > { %1065 = vmatpush1.bf16.msra.mxu0 %v3460_v40  ;;  %v4110_v40 = vsub.s32 1, %v780_v37  ;;  %v782_v42 = vrot.slane %v777_v39, %v4105_v38 }
 0x168   : > { %1066 = vmatprep.subr.bf16.mxu0 %v3468_v43  ;;  %1106 = vmatpush1.bf16.msra.mxu1 %v3469_v46 }
 0x169   : > { %1107 = vmatprep.subr.bf16.mxu1 %v3477_v49  ;;  %v786_v46 = vrot.slane %v777_v39, %v4110_v40 }
 0x16b   : > { %1067 = vmatpush1.bf16.msra.mxu0 %v3466_v44  ;;  %v494_v44 = vld [vmem:[%s492_s17 + $0x8] sm:$0xff] }
 0x16c   : > { %1068 = vmatprep.subr.bf16.mxu0 %v3474_v47  ;;  %1108 = vmatpush1.bf16.msra.mxu1 %v3475_v50 }
 0x16d   : > { %1109 = vmatprep.subr.bf16.mxu1 %v3483_v53 }
 0x16f   : > { %1069 = vmatpush1.bf16.msra.mxu0 %v3472_v48 }
 0x170   : > { %1070 = vmatprep.subr.bf16.mxu0 %v3480_v51  ;;  %1110 = vmatpush1.bf16.msra.mxu1 %v3481_v54 }
 0x171   : > { %1111 = vmatprep.subr.bf16.mxu1 %v3489_v57  ;;  %v496_v57 = vld [vmem:[%s492_s17 + $0x18] sm:$0xff] }
 0x173   : > { %1071 = vmatpush1.bf16.msra.mxu0 %v3478_v52 }
 0x174   : > { %1072 = vmatprep.subr.bf16.mxu0 %v3486_v55  ;;  %1112 = vmatpush1.bf16.msra.mxu1 %v3487_v58  ;;  %v4114_v55 = vsub.s32 3, %v780_v37 }
 0x175   : > { %1113 = vmatprep.subr.bf16.mxu1 %v3495_v61  ;;  %v495_v61 = vld [vmem:[%s492_s17 + $0x10] sm:$0xff] }
 0x176   : > { %v794_v0 = vrot.slane %v777_v39, %v4114_v55 }
 0x177   : > { %1073 = vmatpush1.bf16.msra.mxu0 %v3484_v56 }
 0x178   : > { %1074 = vmatprep.subr.bf16.mxu0 %v3492_v59  ;;  %1114 = vmatpush1.bf16.msra.mxu1 %v3493_v62  ;;  %v4116_v59 = vsub.s32 2, %v780_v37 }
 0x179   : > { %1115 = vmatprep.subr.bf16.mxu1 %v3498_v3 }
 0x17b   : > { %1075 = vmatpush1.bf16.msra.mxu0 %v3490_v60 }
 0x17c   : > { %1116 = vmatpush1.bf16.msra.mxu1 %v3496_v4  ;;  %1302 = vmatprep.subr.bf16.mxu0 %v3501_v5  ;;  %v790_v4 = vrot.slane %v777_v39, %v4116_v59 }
 0x17d   : > { %1343 = vmatprep.subr.bf16.mxu1 %v3504_v6 }
 0x17e   : > { %1093 = vmatmul.mubr.bf16.vlgmr.msra.gmra.mxu0 %v866_v2 }
 0x17f   : > { %1334 = vmatprep.mubr.bf16.mxu0 %v3974_v63  ;;  %1134 = vmatmul.mubr.bf16.vlgmr.msra.gmra.mxu1 %v866_v2 }
 0x180   : > { %1303 = vmatpush1.bf16.msra.mxu0 %v3499_v7  ;;  %1344 = vmatpush1.bf16.msra.mxu1 %v3502_v8 }
 0x181   : > { %1375 = vmatprep.mubr.bf16.mxu1 %v3974_v63  ;;  %1304 = vmatprep.subr.bf16.mxu0 %v3507_v9  ;;  %v3523_v63 = vld [vmem:[#allocation9 + $0x160] ss:$16 sps:$4 sm:$0xff]  }
 0x182   : > { %1345 = vmatprep.subr.bf16.mxu1 %v3510_v10 }
 0x184   : > { %1305 = vmatpush1.bf16.msra.mxu0 %v3505_v11  ;;  %1346 = vmatpush1.bf16.msra.mxu1 %v3508_v12 }
 0x185   : > { %1306 = vmatprep.subr.bf16.mxu0 %v3513_v13  ;;  %1347 = vmatprep.subr.bf16.mxu1 %v3516_v14 }
 0x188   : > { %1307 = vmatpush1.bf16.msra.mxu0 %v3511_v15  ;;  %1348 = vmatpush1.bf16.msra.mxu1 %v3514_v16  ;;  %v803_v15 = vld [vmem:[#allocation3 + $0x8] sm:$0xff] }
 0x189   : > { %1308 = vmatprep.subr.bf16.mxu0 %v3519_v17  ;;  %1349 = vmatprep.subr.bf16.mxu1 %v3522_v18 }
 0x18c   : > { %1309 = vmatpush1.bf16.msra.mxu0 %v3517_v19  ;;  %1350 = vmatpush1.bf16.msra.mxu1 %v3520_v20 }
 0x18d   : > { %1310 = vmatprep.subr.bf16.mxu0 %v3525_v21  ;;  %1351 = vmatprep.subr.bf16.mxu1 %v3528_v23 }
 0x190   : > { %1311 = vmatpush1.bf16.msra.mxu0 %v3523_v63  ;;  %1352 = vmatpush1.bf16.msra.mxu1 %v3526_v22 }
 0x191   : > { %1312 = vmatprep.subr.bf16.mxu0 %v3531_v24  ;;  %1353 = vmatprep.subr.bf16.mxu1 %v3534_v25 }
 0x194   : > { %1313 = vmatpush1.bf16.msra.mxu0 %v3529_v26  ;;  %1354 = vmatpush1.bf16.msra.mxu1 %v3532_v27 }
 0x195   : > { %1314 = vmatprep.subr.bf16.mxu0 %v3537_v28  ;;  %1355 = vmatprep.subr.bf16.mxu1 %v3540_v29 }
 0x198   : > { %1315 = vmatpush1.bf16.msra.mxu0 %v3535_v30  ;;  %1356 = vmatpush1.bf16.msra.mxu1 %v3538_v31 }
 0x199   : > { %1316 = vmatprep.subr.bf16.mxu0 %v3543_v32  ;;  %1357 = vmatprep.subr.bf16.mxu1 %v3546_v33  ;;  %v3094_v32 = vld [vmem:[%s4271_s4 + $0x4] sm:$0xf] }
 0x19a   : > { %v1390_v33 = vrot.slane %v3094_v32, %v4105_v38  ;;  %v1394_v39 = vrot.slane %v3094_v32, %v4110_v40 }
 0x19c   : > { %1317 = vmatpush1.bf16.msra.mxu0 %v3541_v34  ;;  %1358 = vmatpush1.bf16.msra.mxu1 %v3544_v35 }
 0x21e   : > { %v725_v43 = vpop.f32.mrf.mxu0  ;;  %v766_v53 = vpop.f32.mrf.mxu1 }
 0x21f   : > { %v773_v45 = vadd.f32 %v725_v43, %v493_v41  ;;  %v775_v3 = vadd.f32 %v766_v53, %v495_v61  ;;  %v1402_v53 = vrot.slane %v3094_v32, %v4114_v55 }
 0x220   : > { %v727_v47 = vpop.f32.mrf.mxu0  ;;  %v768_v58 = vpop.f32.mrf.mxu1 }
 0x221   : > { %v799_v48 = vadd.f32 %v782_v42, %v773_v45  ;;  %v774_v49 = vadd.f32 %v727_v47, %v494_v44  ;;  %v776_v62 = vadd.f32 %v768_v58, %v496_v57  ;;  %v801_v6 = vadd.f32 %v790_v4, %v775_v3 }
 0x222   : > { %v729_v50 = vpop.f32.mrf.mxu0  ;;  %v770_v60 = vpop.f32.mrf.mxu1  ;;  %v1398_v57 = vrot.slane %v3094_v32, %v4116_v59 }
 0x223   : > { %v3027_v51 = vmul.f32 -1.442695, %v799_v48  ;;  %v800_v52 = vadd.f32 %v786_v46, %v774_v49  ;;  %v802_v5 = vadd.f32 %v794_v0, %v776_v62 }
 0x224   : > { %v730_v54 = vpop.f32.mrf.mxu0  ;;  %v771_v2 = vpop.f32.mrf.mxu1 }
 0x225   : > { %3547 = vpow2.f32 %v3027_v51  ;;  %v3028_v56 = vmul.f32 -1.442695, %v800_v52  ;;  %v3029_v7 = vmul.f32 -1.442695, %v802_v5  ;;  %v1412_v5 = vld [vmem:[#allocation3] sm:$0xff] }
 0x227   : > { %3549 = vpow2.f32 %v3028_v56 }
 0x228   : > { %3551 = vtanh.f32 %v801_v6 }
 0x229   : > { %3553 = vpow2.f32 %v3029_v7 }
 0x232   : > { %v3548_v8 = vpop.eup %3547 }
 0x233   : > { %v807_v9 = vadd.f32 1.0, %v3548_v8 }
 0x234   : > { %v3550_v10 = vpop.eup %3549 }
 0x235   : > { %3555 = vrcp.f32 %v807_v9  ;;  %v813_v11 = vadd.f32 1.0, %v3550_v10  ;;  %v3552_v12 = vpop.eup %3551 }
 0x236   : > { %v3554_v13 = vpop.eup %3553 }
 0x237   : > { %3557 = vrcp.f32 %v813_v11  ;;  %v820_v17 = vadd.f32 1.0, %v3554_v13 }
 0x239   : > { %3559 = vrcp.f32 %v820_v17 }
 0x23e   : > { %v1094_v24 = vpop.f32.mrf.mxu0 }
 0x23f   : > { %v1135_v28 = vpop.f32.mrf.mxu1 }
 0x240   : > { %v1096_v25 = vpop.f32.mrf.mxu0 }
 0x241   : > { %v1137_v29 = vpop.f32.mrf.mxu1 }
 0x242   : > { %v3556_v14 = vpop.eup %3555  ;;  %v1098_v26 = vpop.f32.mrf.mxu0 }
 0x243   : > { %v824_v19 = vmul.f32 %v3556_v14, %v3552_v12  ;;  %v1139_v30 = vpop.f32.mrf.mxu1 }
 0x244   : > { %v3558_v16 = vpop.eup %3557  ;;  %v1099_v27 = vpop.f32.mrf.mxu0 }
 0x245   : > { %v823_v18 = vmul.f32 %v3558_v16, %v803_v15  ;;  %v1140_v31 = vpop.f32.mrf.mxu1  ;;  %v4132_v15 = vand.u32 (%p483_p11), 127, %v779_v36  ;;  %v1442_v16 = vld [vmem:[%s4272_s5] sm:$0xf] (%p483_p11)  }
 0x246   : > { %v3560_v63 = vpop.eup %3559 }
 0x247   : > { %v825_v20 = vadd.f32 %v824_v19, %v823_v18 }
 0x249   : > { %3561 = vtanh.f32 %v825_v20  ;;  %829 = vst [vmem:[#allocation3 + $0x8] sm:$0xff] %v825_v20 }
 0x256   : > { %v3562_v21 = vpop.eup %3561 }
 0x257   : > { %v827_v22 = vmul.f32 %v3562_v21, %v3560_v63 }
 0x259   : > { %828 = vst [vmem:[#allocation2] sm:$0xff] %v827_v22  ;;  %v830_v23 = vpack.c.bf16 %v827_v22, %v827_v22 }
 0x25b   : > { %1335 = vmatmul.mubr.bf16.vlgmr.msra.gmra.mxu0 %v830_v23  ;;  %1376 = vmatmul.mubr.bf16.vlgmr.msra.gmra.mxu1 %v830_v23 }
 0x31b   : > { %v1336_v34 = vpop.f32.mrf.mxu0  ;;  %v1377_v35 = vpop.f32.mrf.mxu1 }
 0x31c   : > { %v1337_v37 = vadd.f32 %v1336_v34, %v1094_v24  ;;  %v1378_v56 = vadd.f32 %v1377_v35, %v1135_v28 }
 0x31d   : > { %v1338_v41 = vpop.f32.mrf.mxu0  ;;  %v1379_v42 = vpop.f32.mrf.mxu1 }
 0x31e   : > { %v1407_v43 = vadd.f32 %v1390_v33, %v1337_v37  ;;  %v1339_v44 = vadd.f32 %v1338_v41, %v1096_v25  ;;  %v1380_v52 = vadd.f32 %v1379_v42, %v1137_v29  ;;  %v1409_v61 = vadd.f32 %v1398_v57, %v1378_v56 }
 0x31f   : > { %v1340_v45 = vpop.f32.mrf.mxu0  ;;  %v1381_v46 = vpop.f32.mrf.mxu1 }
 0x320   : > { %v3095_v47 = vmul.f32 -1.442695, %v1407_v43  ;;  %v1408_v48 = vadd.f32 %v1394_v39, %v1339_v44  ;;  %v1410_v54 = vadd.f32 %v1402_v53, %v1380_v52 }
 0x321   : > { %v1341_v49 = vpop.f32.mrf.mxu0  ;;  %v1382_v50 = vpop.f32.mrf.mxu1 }
 0x322   : > { %3563 = vpow2.f32 %v3095_v47  ;;  %v3096_v51 = vmul.f32 -1.442695, %v1408_v48  ;;  %v3097_v58 = vmul.f32 -1.442695, %v1410_v54 }
 0x324   : > { %3565 = vpow2.f32 %v3096_v51 }
 0x325   : > { %3567 = vpow2.f32 %v3097_v58 }
 0x32f   : > { %v3564_v60 = vpop.eup %3563 }
 0x330   : > { %v1416_v62 = vadd.f32 1.0, %v3564_v60 }
 0x331   : > { %v3566_v0 = vpop.eup %3565 }
 0x332   : > { %3569 = vrcp.f32 %v1416_v62  ;;  %v1422_v2 = vadd.f32 1.0, %v3566_v0  ;;  %v3568_v3 = vpop.eup %3567 }
 0x333   : > { %3571 = vtanh.f32 %v1409_v61  ;;  %v1429_v8 = vadd.f32 1.0, %v3568_v3 }
 0x334   : > { %3573 = vrcp.f32 %v1422_v2 }
 0x335   : > { %3575 = vrcp.f32 %v1429_v8 }
 0x33f   : > { %v3570_v4 = vpop.eup %3569 }
 0x340   : > { %v3572_v6 = vpop.eup %3571 }
 0x341   : > { %v3574_v7 = vpop.eup %3573  ;;  %v1433_v9 = vmul.f32 %v3572_v6, %v3570_v4 }
 0x342   : > { %v1432_v10 = vmul.f32 %v3574_v7, %v1412_v5  ;;  %v3576_v12 = vpop.eup %3575 }
 0x344   : > { %v1434_v11 = vadd.f32 %v1433_v9, %v1432_v10 }
 0x346   : > { %3577 = vtanh.f32 %v1434_v11  ;;  %1438 = vst [vmem:[#allocation3] sm:$0xff] %v1434_v11 }
 0x352   :  { %485 = sbr.rel (!%p483_p11) target bundleno = 316 (0x13c), region = 115 }
 0x353   : > { %v3578_v13 = vpop.eup %3577 }
 0x354   : > { %v1436_v14 = vmul.f32 %v3578_v13, %v3576_v12 }
 0x356   : > { %1437 = vst [vmem:[#allocation2 + $0x8] sm:$0xff] %v1436_v14 }
 0x357 LB: > { %v3579_v1 = vld [vmem:[%s4273_s6 + $0x38] sm:$0xff]   ;;  %v3975_v36 = vmov 0.0   ;;  %v3580_v17 = vld [vmem:[%s4273_s6 + $0x30] sm:$0xff]   ;;  %vm3976_vm0 = vmmov 0   ;;  %v3977_v18 = vmov 0   ;;  %v3581_v19 = vld [vmem:[%s4273_s6 + $0x28] sm:$0xff]   ;;  %s3963_s21 = sphi %s4139_s21, %s1448_s21   ;;  %v3959_v16 = vphi %v1442_v16, %v2917_v16  }
 0x358   : > { %3272 = vmatprep.subr.bf16.mxu0 %v3975_v36  ;;  %3288 = vmatprep.mubr.msk.bf16.mxu0 %vm3976_vm0, %v3975_v36  ;;  %v3587_v20 = vld [vmem:[#allocation13 + $0xe4] ss:$16 sps:$4 sm:$0xff]   ;;  %v3589_v63 = vld [vmem:[#allocation13 + $0xe0] ss:$16 sps:$4 sm:$0xff]   ;;  %v3583_v25 = vld [vmem:[%s4273_s6 + $0x18] sm:$0xff]   ;;  %s3250_s30 = sshll.u32 %s3963_s21, 3 }
 0x359   : > { %3273 = vmatpush3.bf16.msra.mxu0 %v3579_v1  ;;  %1813 = vmatprep.mubr.bf16.mxu1 %v3977_v18  ;;  %v3582_v21 = vld [vmem:[%s4273_s6 + $0x20] sm:$0xff]   ;;  %v3584_v28 = vld [vmem:[%s4273_s6 + $0x10] sm:$0xff]   ;;  %v3585_v31 = vld [vmem:[%s4273_s6 + $0x8] sm:$0xff]   ;;  %s2880_s13 = scalar_lea.vmem [#allocation15], %s3250_s30  ;;  %s2903_s14 = sld [smem:[#allocation5 + %s3963_s21]] }
 0x35a   : > { %3274 = vmatprep.subr.bf16.mxu0 %v3975_v36  ;;  %1781 = vmatprep.subr.bf16.mxu1 %v3587_v20  ;;  %v3590_v22 = vld [vmem:[#allocation13 + $0xc4] ss:$16 sps:$4 sm:$0xff]   ;;  %v3592_v23 = vld [vmem:[#allocation13 + $0xc0] ss:$16 sps:$4 sm:$0xff]   ;;  %v3595_v35 = vld [vmem:[#allocation13 + $0xec] ss:$16 sps:$4 sm:$0xff]  }
 0x35b   : > { %1782 = vmatpush1.bf16.msra.mxu1 %v3589_v63  ;;  %v3596_v24 = vld [vmem:[#allocation13 + $0xa4] ss:$16 sps:$4 sm:$0xff]   ;;  %v3598_v26 = vld [vmem:[#allocation13 + $0xa0] ss:$16 sps:$4 sm:$0xff]   ;;  %v3593_v41 = vld [vmem:[#allocation13 + $0xe8] ss:$16 sps:$4 sm:$0xff]  }
 0x35c   : > { %1783 = vmatprep.subr.bf16.mxu1 %v3590_v22  ;;  %v3602_v27 = vld [vmem:[#allocation13 + $0x84] ss:$16 sps:$4 sm:$0xff]   ;;  %v3604_v29 = vld [vmem:[#allocation13 + $0x80] ss:$16 sps:$4 sm:$0xff]   ;;  %v3601_v42 = vld [vmem:[#allocation13 + $0xcc] ss:$16 sps:$4 sm:$0xff]  }
 0x35d   : > { %3275 = vmatpush3.bf16.msra.mxu0 %v3580_v17  ;;  %v3608_v30 = vld [vmem:[#allocation13 + $0x64] ss:$16 sps:$4 sm:$0xff]   ;;  %v3610_v32 = vld [vmem:[#allocation13 + $0x60] ss:$16 sps:$4 sm:$0xff]   ;;  %v3599_v45 = vld [vmem:[#allocation13 + $0xc8] ss:$16 sps:$4 sm:$0xff]  }
 0x35e   : > { %3276 = vmatprep.subr.bf16.mxu0 %v3975_v36  ;;  %v3614_v33 = vld [vmem:[#allocation13 + $0x44] ss:$16 sps:$4 sm:$0xff]   ;;  %v3616_v37 = vld [vmem:[#allocation13 + $0x40] ss:$16 sps:$4 sm:$0xff]   ;;  %v3607_v46 = vld [vmem:[#allocation13 + $0xac] ss:$16 sps:$4 sm:$0xff]  }
 0x35f   : > { %1784 = vmatpush1.bf16.msra.mxu1 %v3592_v23  ;;  %v3586_v34 = vld [vmem:[%s4273_s6] sm:$0xff]   ;;  %v3605_v50 = vld [vmem:[#allocation13 + $0xa8] ss:$16 sps:$4 sm:$0xff]   ;;  %v3613_v51 = vld [vmem:[#allocation13 + $0x8c] ss:$16 sps:$4 sm:$0xff]   ;;  %p2904_p12 = scmp.gt.s32.totalorder %s2903_s14, 0 }
 0x360   : > { %1785 = vmatprep.subr.bf16.mxu1 %v3596_v24  ;;  %v3620_v39 = vld [vmem:[#allocation13 + $0x24] ss:$16 sps:$4 sm:$0xff]   ;;  %v3622_v43 = vld [vmem:[#allocation13 + $0x20] ss:$16 sps:$4 sm:$0xff]   ;;  %v3611_v56 = vld [vmem:[#allocation13 + $0x88] ss:$16 sps:$4 sm:$0xff]  }
 0x361   : > { %3277 = vmatpush3.bf16.msra.mxu0 %v3581_v19  ;;  %v3626_v44 = vld [vmem:[#allocation13 + $0x4] ss:$16 sps:$4 sm:$0xff]   ;;  %v3628_v47 = vld [vmem:[#allocation13] ss:$16 sps:$4 sm:$0xff]   ;;  %v3619_v57 = vld [vmem:[#allocation13 + $0x6c] ss:$16 sps:$4 sm:$0xff]  }
 0x362   : > { %3278 = vmatprep.subr.bf16.mxu0 %v3975_v36  ;;  %v1587_v48 = vld [vmem:[#allocation2] sm:$0xff]  ;;  %v3617_v61 = vld [vmem:[#allocation13 + $0x68] ss:$16 sps:$4 sm:$0xff]   ;;  %v3625_v62 = vld [vmem:[#allocation13 + $0x4c] ss:$16 sps:$4 sm:$0xff]   ;;  %s3252_s15 = sshll.u32 %s3963_s21, 2 }
 0x363   : > { %1786 = vmatpush1.bf16.msra.mxu1 %v3598_v26  ;;  %v3637_v49 = vld [vmem:[#allocation12 + $0xe4] ss:$16 sps:$4 sm:$0xff]   ;;  %v1588_v52 = vpack.c.bf16 %v1587_v48, %v1587_v48  ;;  %v3635_v53 = vld [vmem:[#allocation12 + $0xe0] ss:$16 sps:$4 sm:$0xff]   ;;  %v3623_v3 = vld [vmem:[#allocation13 + $0x48] ss:$16 sps:$4 sm:$0xff]   ;;  %s2908_s3 = scalar_lea.vmem %s4272_s5, %s3252_s15 }
 0x364   : > { %1787 = vmatprep.subr.bf16.mxu1 %v3602_v27  ;;  %v3643_v54 = vld [vmem:[#allocation12 + $0xc4] ss:$16 sps:$4 sm:$0xff]   ;;  %v3641_v58 = vld [vmem:[#allocation12 + $0xc0] ss:$16 sps:$4 sm:$0xff]   ;;  %v3631_v4 = vld [vmem:[#allocation13 + $0x2c] ss:$16 sps:$4 sm:$0xff]  }
 0x365   : > { %3279 = vmatpush3.bf16.msra.mxu0 %v3582_v21  ;;  %v3649_v60 = vld [vmem:[#allocation12 + $0xa4] ss:$16 sps:$4 sm:$0xff]   ;;  %v3647_v0 = vld [vmem:[#allocation12 + $0xa0] ss:$16 sps:$4 sm:$0xff]   ;;  %v3629_v7 = vld [vmem:[#allocation13 + $0x28] ss:$16 sps:$4 sm:$0xff]  }
 0x366   : > { %3280 = vmatprep.subr.bf16.mxu0 %v3975_v36  ;;  %v3655_v2 = vld [vmem:[#allocation12 + $0x84] ss:$16 sps:$4 sm:$0xff]   ;;  %v3653_v5 = vld [vmem:[#allocation12 + $0x80] ss:$16 sps:$4 sm:$0xff]   ;;  %v3634_v8 = vld [vmem:[#allocation13 + $0xc] ss:$16 sps:$4 sm:$0xff]  }
 0x367   : > { %1788 = vmatpush1.bf16.msra.mxu1 %v3604_v29  ;;  %v3661_v6 = vld [vmem:[#allocation12 + $0x64] ss:$16 sps:$4 sm:$0xff]   ;;  %v3659_v9 = vld [vmem:[#allocation12 + $0x60] ss:$16 sps:$4 sm:$0xff]   ;;  %v3632_v11 = vld [vmem:[#allocation13 + $0x8] ss:$16 sps:$4 sm:$0xff]  }
 0x368   : > { %1789 = vmatprep.subr.bf16.mxu1 %v3608_v30  ;;  %v3667_v10 = vld [vmem:[#allocation12 + $0x44] ss:$16 sps:$4 sm:$0xff]   ;;  %v3640_v12 = vld [vmem:[#allocation12 + $0xec] ss:$16 sps:$4 sm:$0xff]   ;;  %v3665_v13 = vld [vmem:[#allocation12 + $0x40] ss:$16 sps:$4 sm:$0xff]  }
 0x369   : > { %3281 = vmatpush3.bf16.msra.mxu0 %v3583_v25  ;;  %v3673_v14 = vld [vmem:[#allocation12 + $0x24] ss:$16 sps:$4 sm:$0xff]   ;;  %v3646_v1 = vld [vmem:[#allocation12 + $0xcc] ss:$16 sps:$4 sm:$0xff]   ;;  %v3671_v17 = vld [vmem:[#allocation12 + $0x20] ss:$16 sps:$4 sm:$0xff]  }
 0x36a   : > { %3282 = vmatprep.subr.bf16.mxu0 %v3975_v36  ;;  %v3679_v19 = vld [vmem:[#allocation12 + $0x4] ss:$16 sps:$4 sm:$0xff]   ;;  %v3644_v20 = vld [vmem:[#allocation12 + $0xc8] ss:$16 sps:$4 sm:$0xff]   ;;  %v3652_v63 = vld [vmem:[#allocation12 + $0xac] ss:$16 sps:$4 sm:$0xff]  }
 0x36b   : > { %1790 = vmatpush1.bf16.msra.mxu1 %v3610_v32  ;;  %v3677_v21 = vld [vmem:[#allocation12] ss:$16 sps:$4 sm:$0xff]   ;;  %v3650_v22 = vld [vmem:[#allocation12 + $0xa8] ss:$16 sps:$4 sm:$0xff]   ;;  %v3658_v23 = vld [vmem:[#allocation12 + $0x8c] ss:$16 sps:$4 sm:$0xff]  }
 0x36c   : > { %1791 = vmatprep.subr.bf16.mxu1 %v3614_v33  ;;  %v3656_v24 = vld [vmem:[#allocation12 + $0x88] ss:$16 sps:$4 sm:$0xff]   ;;  %v3664_v25 = vld [vmem:[#allocation12 + $0x6c] ss:$16 sps:$4 sm:$0xff]   ;;  %v3685_v33 = vld [vmem:[#allocation13 + $0x1e4] ss:$16 sps:$4 sm:$0xff]  }
 0x36d   : > { %3283 = vmatpush3.bf16.msra.mxu0 %v3584_v28  ;;  %v3662_v26 = vld [vmem:[#allocation12 + $0x68] ss:$16 sps:$4 sm:$0xff]   ;;  %v3670_v27 = vld [vmem:[#allocation12 + $0x4c] ss:$16 sps:$4 sm:$0xff]   ;;  %s2905_s16 = scalar_select %p2904_p12, 1, 0 }
 0x36e   : > { %3284 = vmatprep.subr.bf16.mxu0 %v3975_v36  ;;  %v3668_v28 = vld [vmem:[#allocation12 + $0x48] ss:$16 sps:$4 sm:$0xff]   ;;  %v3676_v29 = vld [vmem:[#allocation12 + $0x2c] ss:$16 sps:$4 sm:$0xff]   ;;  %s1448_s21 = sadd.s32 1, %s3963_s21  }
 0x36f   : > { %1792 = vmatpush1.bf16.msra.mxu1 %v3616_v37  ;;  %v3674_v30 = vld [vmem:[#allocation12 + $0x28] ss:$16 sps:$4 sm:$0xff]   ;;  %v3683_v37 = vld [vmem:[#allocation13 + $0x1e0] ss:$16 sps:$4 sm:$0xff]   ;;  %s2906_s19 = scvt.s32.f32 %s2905_s16  ;;  %p1445_p13 = scmp.ge.s32.totalorder %s1448_s21, 5  }
 0x370   : > { %1793 = vmatprep.subr.bf16.mxu1 %v3620_v39  ;;  %v3680_v32 = vld [vmem:[#allocation12 + $0x8] ss:$16 sps:$4 sm:$0xff]   ;;  %s3978_s4 = smov (%p1445_p13), [#allocation15]  }
 0x371   : > { %3285 = vmatpush3.bf16.msra.mxu0 %v3585_v31  ;;  %v3682_v31 = vld [vmem:[#allocation12 + $0xc] ss:$16 sps:$4 sm:$0xff]   ;;  %v3689_v39 = vld [vmem:[#allocation13 + $0x1e8] ss:$16 sps:$4 sm:$0xff]   ;;  %s2913_s20 = ssub.f32 1.0, %s2906_s19  ;;  %s2923_s22 = sshll.u32 (%p1445_p13), %s3978_s4, 4  ;;  %s2924_s22 = int_to_ptr.vmem [resolvable:$true] %s2923_s22 }
 0x372   : > { %3286 = vmatprep.subr.bf16.mxu0 %v3975_v36  ;;  %s3911_s23 = scalar_lea.vmem (%p1445_p13), %s2924_s22, 640  ;;  %p3916_p1 = scmp.lt.s32.totalorder (%p1445_p13), %s2924_s22, %s2924_s22 }
 0x373   : > { %1794 = vmatpush1.bf16.msra.mxu1 %v3622_v43  ;;  %p3912_p0 = scmp.ne.s32.totalorder (%p1445_p13), %s2924_s22, %s3911_s23  ;;  %p3917_p2 = scmp.lt.s32.totalorder (%p1445_p13), %s3911_s23, %s3911_s23 }
 0x374   : > { %1795 = vmatprep.subr.bf16.mxu1 %v3626_v44 }
 0x375   : > { %3287 = vmatpush3.bf16.msra.mxu0 %v3586_v34  ;;  %v3691_v34 = vld [vmem:[#allocation13 + $0x1ec] ss:$16 sps:$4 sm:$0xff]   ;;  %p3918_p3 = por (%p1445_p13), %p3917_p2, %p3916_p1 }
 0x376   : > { %1822 = vmatprep.subr.bf16.mxu0 %v3595_v35 }
 0x377   : > { %1796 = vmatpush1.bf16.msra.mxu1 %v3628_v47  ;;  %p3919_p4 = pnand (%p1445_p13), %p3918_p3, %p3912_p0 }
 0x378   : > { %3289 = vmatmul.mubr.bf16.vlgmr.msra.gmra.mxu0 %v3959_v16  ;;  %2023 = vmatprep.subr.bf16.mxu1 %v3637_v49  ;;  %v3638_v16 = vld [vmem:[#allocation12 + $0xe8] ss:$16 sps:$4 sm:$0xff]  }
 0x379   : > { %1823 = vmatpush1.bf16.msra.mxu0 %v3593_v41  ;;  %1854 = vmatprep.mubr.bf16.mxu0 %v3977_v18 }
 0x37a   : > { %1824 = vmatprep.subr.bf16.mxu0 %v3601_v42  ;;  %1814 = vmatmul.mubr.bf16.vlgmr.msra.gmra.mxu1 %v1588_v52  ;;  %v3688_v42 = vld [vmem:[#allocation13 + $0x1c4] ss:$16 sps:$4 sm:$0xff]  }
 0x37b   : > { %2024 = vmatpush1.bf16.msra.mxu1 %v3635_v53  ;;  %2055 = vmatprep.mubr.bf16.mxu1 %v3977_v18 }
 0x37c   : > { %2025 = vmatprep.subr.bf16.mxu1 %v3643_v54 }
 0x37d   : > { %1825 = vmatpush1.bf16.msra.mxu0 %v3599_v45  ;;  %v3686_v45 = vld [vmem:[#allocation13 + $0x1c0] ss:$16 sps:$4 sm:$0xff]  }
 0x37e   : > { %1826 = vmatprep.subr.bf16.mxu0 %v3607_v46 }
 0x37f   : > { %2026 = vmatpush1.bf16.msra.mxu1 %v3641_v58  ;;  %v3697_v58 = vld [vmem:[#allocation13 + $0x1cc] ss:$16 sps:$4 sm:$0xff]  }
 0x380   : > { %2027 = vmatprep.subr.bf16.mxu1 %v3649_v60  ;;  %v3695_v60 = vld [vmem:[#allocation13 + $0x1c8] ss:$16 sps:$4 sm:$0xff]  }
 0x381   : > { %1827 = vmatpush1.bf16.msra.mxu0 %v3605_v50 }
 0x382   : > { %1828 = vmatprep.subr.bf16.mxu0 %v3613_v51 }
 0x383   : > { %2028 = vmatpush1.bf16.msra.mxu1 %v3647_v0  ;;  %v3703_v0 = vld [vmem:[#allocation13 + $0x1ac] ss:$16 sps:$4 sm:$0xff]  }
 0x384   : > { %2029 = vmatprep.subr.bf16.mxu1 %v3655_v2  ;;  %v3701_v2 = vld [vmem:[#allocation13 + $0x1a8] ss:$16 sps:$4 sm:$0xff]  }
 0x385   : > { %1829 = vmatpush1.bf16.msra.mxu0 %v3611_v56  ;;  %v3694_v56 = vld [vmem:[#allocation13 + $0x1a4] ss:$16 sps:$4 sm:$0xff]  }
 0x386   : > { %1830 = vmatprep.subr.bf16.mxu0 %v3619_v57  ;;  %v3692_v57 = vld [vmem:[#allocation13 + $0x1a0] ss:$16 sps:$4 sm:$0xff]  }
 0x387   : > { %2030 = vmatpush1.bf16.msra.mxu1 %v3653_v5  ;;  %v3709_v5 = vld [vmem:[#allocation13 + $0x18c] ss:$16 sps:$4 sm:$0xff]  }
 0x388   : > { %2031 = vmatprep.subr.bf16.mxu1 %v3661_v6  ;;  %v3707_v6 = vld [vmem:[#allocation13 + $0x188] ss:$16 sps:$4 sm:$0xff]  }
 0x389   : > { %1831 = vmatpush1.bf16.msra.mxu0 %v3617_v61  ;;  %v3700_v61 = vld [vmem:[#allocation13 + $0x184] ss:$16 sps:$4 sm:$0xff]  }
 0x38a   : > { %1832 = vmatprep.subr.bf16.mxu0 %v3625_v62  ;;  %v3698_v62 = vld [vmem:[#allocation13 + $0x180] ss:$16 sps:$4 sm:$0xff]  }
 0x38b   : > { %2032 = vmatpush1.bf16.msra.mxu1 %v3659_v9  ;;  %v3715_v9 = vld [vmem:[#allocation13 + $0x16c] ss:$16 sps:$4 sm:$0xff]  }
 0x38c   : > { %2033 = vmatprep.subr.bf16.mxu1 %v3667_v10  ;;  %v3713_v10 = vld [vmem:[#allocation13 + $0x168] ss:$16 sps:$4 sm:$0xff]  }
 0x38d   : > { %1833 = vmatpush1.bf16.msra.mxu0 %v3623_v3  ;;  %v3706_v3 = vld [vmem:[#allocation13 + $0x164] ss:$16 sps:$4 sm:$0xff]  }
 0x38e   : > { %1834 = vmatprep.subr.bf16.mxu0 %v3631_v4  ;;  %v3704_v4 = vld [vmem:[#allocation13 + $0x160] ss:$16 sps:$4 sm:$0xff]  }
 0x38f   : > { %2034 = vmatpush1.bf16.msra.mxu1 %v3665_v13  ;;  %v3721_v13 = vld [vmem:[#allocation13 + $0x14c] ss:$16 sps:$4 sm:$0xff]  }
 0x390   : > { %2035 = vmatprep.subr.bf16.mxu1 %v3673_v14  ;;  %v3719_v14 = vld [vmem:[#allocation13 + $0x148] ss:$16 sps:$4 sm:$0xff]  }
 0x391   : > { %1835 = vmatpush1.bf16.msra.mxu0 %v3629_v7  ;;  %v3712_v7 = vld [vmem:[#allocation13 + $0x144] ss:$16 sps:$4 sm:$0xff]  }
 0x392   : > { %1836 = vmatprep.subr.bf16.mxu0 %v3634_v8  ;;  %v3710_v8 = vld [vmem:[#allocation13 + $0x140] ss:$16 sps:$4 sm:$0xff]  }
 0x393   : > { %2036 = vmatpush1.bf16.msra.mxu1 %v3671_v17  ;;  %v3727_v17 = vld [vmem:[#allocation13 + $0x12c] ss:$16 sps:$4 sm:$0xff]  }
 0x394   : > { %2037 = vmatprep.subr.bf16.mxu1 %v3679_v19  ;;  %v3725_v19 = vld [vmem:[#allocation13 + $0x128] ss:$16 sps:$4 sm:$0xff]  }
 0x395   : > { %1837 = vmatpush1.bf16.msra.mxu0 %v3632_v11  ;;  %v3718_v11 = vld [vmem:[#allocation13 + $0x124] ss:$16 sps:$4 sm:$0xff]  }
 0x396   : > { %2064 = vmatprep.subr.bf16.mxu0 %v3640_v12  ;;  %v3716_v12 = vld [vmem:[#allocation13 + $0x120] ss:$16 sps:$4 sm:$0xff]  }
 0x397   : > { %2038 = vmatpush1.bf16.msra.mxu1 %v3677_v21  ;;  %v3730_v21 = vld [vmem:[#allocation13 + $0x10c] ss:$16 sps:$4 sm:$0xff]  }
 0x398   : > { %1855 = vmatmul.mubr.bf16.vlgmr.msra.gmra.mxu0 %v1588_v52  ;;  %2388 = vmatprep.subr.bf16.mxu1 %v3685_v33  ;;  %v3743_v33 = vld [vmem:[#allocation12 + $0x1a0] ss:$16 sps:$4 sm:$0xff]  }
 0x399   : > { %2065 = vmatpush1.bf16.msra.mxu0 %v3638_v16  ;;  %2096 = vmatprep.mubr.bf16.mxu0 %v3977_v18  ;;  %v3724_v16 = vld [vmem:[#allocation13 + $0x104] ss:$16 sps:$4 sm:$0xff]  }
 0x39a   : > { %2066 = vmatprep.subr.bf16.mxu0 %v3646_v1  ;;  %v3722_v1 = vld [vmem:[#allocation13 + $0x100] ss:$16 sps:$4 sm:$0xff]  }
 0x39d   : > { %2067 = vmatpush1.bf16.msra.mxu0 %v3644_v20  ;;  %v2193_v20 = vld [vmem:[#allocation2 + $0x8] sm:$0xff] }
 0x39e   : > { %2068 = vmatprep.subr.bf16.mxu0 %v3652_v63  ;;  %v2194_v63 = vpack.c.bf16 %v2193_v20, %v2193_v20 }
 0x3a1   : > { %2069 = vmatpush1.bf16.msra.mxu0 %v3650_v22  ;;  %v3728_v22 = vld [vmem:[#allocation13 + $0x108] ss:$16 sps:$4 sm:$0xff]  }
 0x3a2   : > { %2070 = vmatprep.subr.bf16.mxu0 %v3658_v23  ;;  %v3733_v23 = vld [vmem:[#allocation12 + $0x1e4] ss:$16 sps:$4 sm:$0xff]  }
 0x3a5   : > { %2071 = vmatpush1.bf16.msra.mxu0 %v3656_v24  ;;  %v3736_v24 = vld [vmem:[#allocation12 + $0x1ec] ss:$16 sps:$4 sm:$0xff]  }
 0x3a6   : > { %2072 = vmatprep.subr.bf16.mxu0 %v3664_v25  ;;  %v3731_v25 = vld [vmem:[#allocation12 + $0x1e0] ss:$16 sps:$4 sm:$0xff]  }
 0x3a9   : > { %2073 = vmatpush1.bf16.msra.mxu0 %v3662_v26  ;;  %v3734_v26 = vld [vmem:[#allocation12 + $0x1e8] ss:$16 sps:$4 sm:$0xff]  }
 0x3aa   : > { %2074 = vmatprep.subr.bf16.mxu0 %v3670_v27  ;;  %v3739_v27 = vld [vmem:[#allocation12 + $0x1c4] ss:$16 sps:$4 sm:$0xff]  }
 0x3ad   : > { %2075 = vmatpush1.bf16.msra.mxu0 %v3668_v28  ;;  %v3742_v28 = vld [vmem:[#allocation12 + $0x1cc] ss:$16 sps:$4 sm:$0xff]  }
 0x3ae   : > { %2076 = vmatprep.subr.bf16.mxu0 %v3676_v29  ;;  %v3737_v29 = vld [vmem:[#allocation12 + $0x1c0] ss:$16 sps:$4 sm:$0xff]  }
 0x3b1   : > { %2077 = vmatpush1.bf16.msra.mxu0 %v3674_v30  ;;  %v3740_v30 = vld [vmem:[#allocation12 + $0x1c8] ss:$16 sps:$4 sm:$0xff]  }
 0x3b2   : > { %2078 = vmatprep.subr.bf16.mxu0 %v3682_v31  ;;  %v3745_v31 = vld [vmem:[#allocation12 + $0x1a4] ss:$16 sps:$4 sm:$0xff]  }
 0x3b5   : > { %2079 = vmatpush1.bf16.msra.mxu0 %v3680_v32  ;;  %v3748_v32 = vld [vmem:[#allocation12 + $0x1ac] ss:$16 sps:$4 sm:$0xff]  }
 0x3b6   : > { %2429 = vmatprep.subr.bf16.mxu0 %v3691_v34  ;;  %v3746_v34 = vld [vmem:[#allocation12 + $0x1a8] ss:$16 sps:$4 sm:$0xff]  }
 0x438   : > { %v1548_v35 = vpop.f32.mrf.mxu0 }
 0x439   : > { %v1554_v41 = vpack.c.bf16 %v1548_v35, %v1548_v35  ;;  %v3751_v35 = vld [vmem:[#allocation12 + $0x184] ss:$16 sps:$4 sm:$0xff]  }
 0x43a   : > { %v3290_v43 = vpop.f32.mrf.mxu0  ;;  %v4185_v47 = vpop.f32.mrf.mxu1 }
 0x43b   : > { %2056 = vmatmul.mubr.bf16.vlgmr.msra.gmra.mxu1 %v1554_v41  ;;  %2097 = vmatmul.mubr.bf16.vlgmr.msra.gmra.mxu0 %v1554_v41  ;;  %v3752_v41 = vld [vmem:[#allocation12 + $0x188] ss:$16 sps:$4 sm:$0xff]  }
 0x43c   : > { %v1551_v44 = vpop.f32.mrf.mxu0  ;;  %2389 = vmatpush1.bf16.msra.mxu1 %v3683_v37  ;;  %2430 = vmatpush1.bf16.msra.mxu0 %v3689_v39  ;;  %v4187_v48 = vpop.f32.mrf.mxu1  ;;  %v3754_v37 = vld [vmem:[#allocation12 + $0x18c] ss:$16 sps:$4 sm:$0xff]   ;;  %v3749_v39 = vld [vmem:[#allocation12 + $0x180] ss:$16 sps:$4 sm:$0xff]   ;;  %v3758_v43 = vld [vmem:[#allocation12 + $0x168] ss:$16 sps:$4 sm:$0xff]  }
 0x43d   : > { %2390 = vmatprep.subr.bf16.mxu1 %v3688_v42  ;;  %2420 = vmatprep.mubr.bf16.mxu1 %v3977_v18  ;;  %v3757_v42 = vld [vmem:[#allocation12 + $0x164] ss:$16 sps:$4 sm:$0xff]   ;;  %v3760_v44 = vld [vmem:[#allocation12 + $0x16c] ss:$16 sps:$4 sm:$0xff]  }
 0x43e   : > { %v3291_v46 = vpop.f32.mrf.mxu0  ;;  %2461 = vmatprep.mubr.bf16.mxu0 %v3977_v18  ;;  %v1819_v49 = vpop.f32.mrf.mxu1  ;;  %2431 = vmatprep.subr.bf16.mxu0 %v3697_v58  ;;  %v3775_v58 = vld [vmem:[#allocation12 + $0x104] ss:$16 sps:$4 sm:$0xff]  }
 0x43f   : > { %v3766_v46 = vld [vmem:[#allocation12 + $0x14c] ss:$16 sps:$4 sm:$0xff]   ;;  %v3761_v49 = vld [vmem:[#allocation12 + $0x140] ss:$16 sps:$4 sm:$0xff]  }
 0x440   : > { %2391 = vmatpush1.bf16.msra.mxu1 %v3686_v45  ;;  %v1820_v50 = vpop.f32.mrf.mxu1  ;;  %2432 = vmatpush1.bf16.msra.mxu0 %v3695_v60  ;;  %v3763_v45 = vld [vmem:[#allocation12 + $0x144] ss:$16 sps:$4 sm:$0xff]   ;;  %v3778_v60 = vld [vmem:[#allocation12 + $0x10c] ss:$16 sps:$4 sm:$0xff]  }
 0x441   : > { %2392 = vmatprep.subr.bf16.mxu1 %v3694_v56  ;;  %2433 = vmatprep.subr.bf16.mxu0 %v3703_v0  ;;  %v3764_v50 = vld [vmem:[#allocation12 + $0x148] ss:$16 sps:$4 sm:$0xff]   ;;  %v3767_v56 = vld [vmem:[#allocation12 + $0x120] ss:$16 sps:$4 sm:$0xff]  }
 0x442   : > { %v2105_v0 = vld [vmem:[%s4276_s9] sm:$0xf] }
 0x444   : > { %2393 = vmatpush1.bf16.msra.mxu1 %v3692_v57  ;;  %2434 = vmatpush1.bf16.msra.mxu0 %v3701_v2  ;;  %v3770_v57 = vld [vmem:[#allocation12 + $0x128] ss:$16 sps:$4 sm:$0xff]   ;;  %v2110_v2 = vrot.slane %v2105_v0, %v4105_v38 }
 0x445   : > { %2394 = vmatprep.subr.bf16.mxu1 %v3700_v61  ;;  %2435 = vmatprep.subr.bf16.mxu0 %v3709_v5  ;;  %v3773_v61 = vld [vmem:[#allocation12 + $0x100] ss:$16 sps:$4 sm:$0xff]  }
 0x448   : > { %2395 = vmatpush1.bf16.msra.mxu1 %v3698_v62  ;;  %2436 = vmatpush1.bf16.msra.mxu0 %v3707_v6  ;;  %v3776_v62 = vld [vmem:[#allocation12 + $0x108] ss:$16 sps:$4 sm:$0xff]   ;;  %v2114_v6 = vrot.slane %v2105_v0, %v4110_v40 }
 0x449   : > { %2396 = vmatprep.subr.bf16.mxu1 %v3706_v3  ;;  %2437 = vmatprep.subr.bf16.mxu0 %v3715_v9 }
 0x44c   : > { %2397 = vmatpush1.bf16.msra.mxu1 %v3704_v4  ;;  %2438 = vmatpush1.bf16.msra.mxu0 %v3713_v10 }
 0x44d   : > { %2398 = vmatprep.subr.bf16.mxu1 %v3712_v7  ;;  %2439 = vmatprep.subr.bf16.mxu0 %v3721_v13 }
 0x450   : > { %2399 = vmatpush1.bf16.msra.mxu1 %v3710_v8  ;;  %2440 = vmatpush1.bf16.msra.mxu0 %v3719_v14 }
 0x451   : > { %2400 = vmatprep.subr.bf16.mxu1 %v3718_v11  ;;  %2441 = vmatprep.subr.bf16.mxu0 %v3727_v17 }
 0x454   : > { %2401 = vmatpush1.bf16.msra.mxu1 %v3716_v12  ;;  %2442 = vmatpush1.bf16.msra.mxu0 %v3725_v19 }
 0x455   : > { %2402 = vmatprep.subr.bf16.mxu1 %v3724_v16  ;;  %2443 = vmatprep.subr.bf16.mxu0 %v3730_v21  ;;  %v2118_v21 = vrot.slane %v2105_v0, %v4116_v59 }
 0x458   : > { %v4189_v51 = vpop.f32.mrf.mxu0  ;;  %2403 = vmatpush1.bf16.msra.mxu1 %v3722_v1  ;;  %2444 = vmatpush1.bf16.msra.mxu0 %v3728_v22 }
 0x459   : > { %2630 = vmatprep.subr.bf16.mxu1 %v3733_v23  ;;  %2671 = vmatprep.subr.bf16.mxu0 %v3736_v24 }
 0x45a   : > { %v4191_v52 = vpop.f32.mrf.mxu0 }
 0x45b   : > { %2421 = vmatmul.mubr.bf16.vlgmr.msra.gmra.mxu1 %v2194_v63  ;;  %2462 = vmatmul.mubr.bf16.vlgmr.msra.gmra.mxu0 %v2194_v63 }
 0x45c   : > { %v1860_v53 = vpop.f32.mrf.mxu0  ;;  %2662 = vmatprep.mubr.bf16.mxu1 %v3977_v18  ;;  %2631 = vmatpush1.bf16.msra.mxu1 %v3731_v25 }
 0x45d   : > { %2672 = vmatpush1.bf16.msra.mxu0 %v3734_v26  ;;  %2703 = vmatprep.mubr.bf16.mxu0 %v3977_v18  ;;  %v3755_v18 = vld [vmem:[#allocation12 + $0x160] ss:$16 sps:$4 sm:$0xff]   ;;  %v3769_v53 = vld [vmem:[#allocation12 + $0x124] ss:$16 sps:$4 sm:$0xff]  }
 0x45e   : > { %v1861_v54 = vpop.f32.mrf.mxu0  ;;  %2632 = vmatprep.subr.bf16.mxu1 %v3739_v27  ;;  %2673 = vmatprep.subr.bf16.mxu0 %v3742_v28 }
 0x45f   : > { %v3772_v54 = vld [vmem:[#allocation12 + $0x12c] ss:$16 sps:$4 sm:$0xff]  }
 0x460   : > { %2633 = vmatpush1.bf16.msra.mxu1 %v3737_v29 }
 0x461   : > { %2674 = vmatpush1.bf16.msra.mxu0 %v3740_v30  ;;  %2634 = vmatprep.subr.bf16.mxu1 %v3745_v31 }
 0x462   : > { %2675 = vmatprep.subr.bf16.mxu0 %v3748_v32 }
 0x464   : > { %2635 = vmatpush1.bf16.msra.mxu1 %v3743_v33 }
 0x465   : > { %2676 = vmatpush1.bf16.msra.mxu0 %v3746_v34  ;;  %2636 = vmatprep.subr.bf16.mxu1 %v3751_v35 }
 0x466   : > { %2677 = vmatprep.subr.bf16.mxu0 %v3754_v37 }
 0x468   : > { %2637 = vmatpush1.bf16.msra.mxu1 %v3749_v39 }
 0x469   : > { %2678 = vmatpush1.bf16.msra.mxu0 %v3752_v41  ;;  %2638 = vmatprep.subr.bf16.mxu1 %v3757_v42 }
 0x46a   : > { %2679 = vmatprep.subr.bf16.mxu0 %v3760_v44 }
 0x46c   : > { %2639 = vmatpush1.bf16.msra.mxu1 %v3755_v18 }
 0x46d   : > { %2680 = vmatpush1.bf16.msra.mxu0 %v3758_v43  ;;  %2640 = vmatprep.subr.bf16.mxu1 %v3763_v45 }
 0x46e   : > { %2681 = vmatprep.subr.bf16.mxu0 %v3766_v46 }
 0x470   : > { %2641 = vmatpush1.bf16.msra.mxu1 %v3761_v49 }
 0x471   : > { %2682 = vmatpush1.bf16.msra.mxu0 %v3764_v50  ;;  %2642 = vmatprep.subr.bf16.mxu1 %v3769_v53  ;;  %v3779_v50 = vld [vmem:[%s4277_s10 + $0x38] sm:$0xff]   ;;  %v3780_v53 = vld [vmem:[%s4277_s10 + $0x30] sm:$0xff]  }
 0x472   : > { %2683 = vmatprep.subr.bf16.mxu0 %v3772_v54  ;;  %v3781_v54 = vld [vmem:[%s4277_s10 + $0x28] sm:$0xff]  }
 0x474   : > { %2643 = vmatpush1.bf16.msra.mxu1 %v3767_v56  ;;  %v3782_v56 = vld [vmem:[%s4277_s10 + $0x20] sm:$0xff]  }
 0x475   : > { %2684 = vmatpush1.bf16.msra.mxu0 %v3770_v57  ;;  %2644 = vmatprep.subr.bf16.mxu1 %v3775_v58  ;;  %v3783_v57 = vld [vmem:[%s4277_s10 + $0x18] sm:$0xff]   ;;  %v3784_v58 = vld [vmem:[%s4277_s10 + $0x10] sm:$0xff]  }
 0x476   : > { %2685 = vmatprep.subr.bf16.mxu0 %v3778_v60  ;;  %v3785_v60 = vld [vmem:[%s4277_s10 + $0x8] sm:$0xff]  }
 0x478   : > { %2645 = vmatpush1.bf16.msra.mxu1 %v3773_v61  ;;  %v3786_v61 = vld [vmem:[%s4277_s10] sm:$0xff]  }
 0x479   : > { %2686 = vmatpush1.bf16.msra.mxu0 %v3776_v62  ;;  %3292 = vmatprep.subr.bf16.mxu1 %v3975_v36  ;;  %v3237_v62 = vld [vmem:[%s4276_s9 + $0x4] sm:$0xf] }
 0x4fb   : > { %v2057_v3 = vpop.f32.mrf.mxu1  ;;  %v2098_v4 = vpop.f32.mrf.mxu0 }
 0x4fc   : > { %v2058_v5 = vadd.f32 %v2057_v3, %v4185_v47  ;;  %v2122_v47 = vrot.slane %v2105_v0, %v4114_v55  ;;  %v2099_v63 = vadd.f32 %v2098_v4, %v4189_v51  ;;  %v2718_v0 = vrot.slane %v3237_v62, %v4105_v38 }
 0x4fd   : > { %v2059_v7 = vpop.f32.mrf.mxu1  ;;  %v2100_v8 = vpop.f32.mrf.mxu0 }
 0x4fe   : > { %v2127_v9 = vadd.f32 %v2110_v2, %v2058_v5  ;;  %v2060_v10 = vadd.f32 %v2059_v7, %v4187_v48  ;;  %v2101_v19 = vadd.f32 %v2100_v8, %v4191_v52  ;;  %v2129_v23 = vadd.f32 %v2118_v21, %v2099_v63  ;;  %v2131_v52 = vld [vmem:[#allocation3 + $0x8] sm:$0xff] }
 0x4ff   : > { %v2061_v11 = vpop.f32.mrf.mxu1  ;;  %v2102_v12 = vpop.f32.mrf.mxu0  ;;  %v2722_v5 = vrot.slane %v3237_v62, %v4110_v40  ;;  %v2726_v63 = vrot.slane %v3237_v62, %v4116_v59 }
 0x500   : > { %v3170_v13 = vmul.f32 -1.442695, %v2127_v9  ;;  %v2128_v14 = vadd.f32 %v2114_v6, %v2060_v10  ;;  %v2130_v20 = vadd.f32 %v2122_v47, %v2101_v19  ;;  %v2730_v19 = vrot.slane %v3237_v62, %v4114_v55 }
 0x501   : > { %v2062_v16 = vpop.f32.mrf.mxu1  ;;  %v2103_v1 = vpop.f32.mrf.mxu0 }
 0x502   : > { %3787 = vpow2.f32 %v3170_v13  ;;  %v3171_v17 = vmul.f32 -1.442695, %v2128_v14  ;;  %v3172_v22 = vmul.f32 -1.442695, %v2130_v20 }
 0x504   : > { %3789 = vpow2.f32 %v3171_v17 }
 0x505   : > { %3791 = vpow2.f32 %v3172_v22 }
 0x50f   : > { %v3788_v48 = vpop.eup %3787 }
 0x510   : > { %v2135_v24 = vadd.f32 1.0, %v3788_v48 }
 0x511   : > { %v3790_v25 = vpop.eup %3789 }
 0x512   : > { %3793 = vrcp.f32 %v2135_v24  ;;  %v2141_v26 = vadd.f32 1.0, %v3790_v25  ;;  %v3792_v27 = vpop.eup %3791 }
 0x513   : > { %3795 = vtanh.f32 %v2129_v23  ;;  %v2148_v31 = vadd.f32 1.0, %v3792_v27 }
 0x514   : > { %3797 = vrcp.f32 %v2141_v26 }
 0x515   : > { %3799 = vrcp.f32 %v2148_v31 }
 0x51b   : > { %v2422_v41 = vpop.f32.mrf.mxu1  ;;  %v2463_v44 = vpop.f32.mrf.mxu0 }
 0x51d   : > { %v2424_v18 = vpop.f32.mrf.mxu1  ;;  %v2465_v45 = vpop.f32.mrf.mxu0 }
 0x51f   : > { %v3794_v28 = vpop.eup %3793  ;;  %v2426_v42 = vpop.f32.mrf.mxu1 }
 0x520   : > { %v3796_v29 = vpop.eup %3795  ;;  %v2467_v46 = vpop.f32.mrf.mxu0 }
 0x521   : > { %v3798_v30 = vpop.eup %3797  ;;  %v2152_v32 = vmul.f32 %v3796_v29, %v3794_v28  ;;  %v2427_v43 = vpop.f32.mrf.mxu1  ;;  %v2740_v28 = vld [vmem:[#allocation3] sm:$0xff] }
 0x522   : > { %v2151_v51 = vmul.f32 %v3798_v30, %v2131_v52  ;;  %v3800_v34 = vpop.eup %3799  ;;  %v2468_v49 = vpop.f32.mrf.mxu0 }
 0x524   : > { %v2153_v33 = vadd.f32 %v2152_v32, %v2151_v51 }
 0x526   : > { %2157 = vst [vmem:[#allocation3 + $0x8] sm:$0xff] %v2153_v33  ;;  %3801 = vtanh.f32 %v2153_v33 }
 0x533   : > { %v3802_v35 = vpop.eup %3801 }
 0x534   : > { %v2155_v37 = vmul.f32 %v3802_v35, %v3800_v34 }
 0x536   : > { %2156 = vst [vmem:[#allocation2] sm:$0xff] %v2155_v37  ;;  %v2158_v39 = vpack.c.bf16 %v2155_v37, %v2155_v37 }
 0x538   : > { %2663 = vmatmul.mubr.bf16.vlgmr.msra.gmra.mxu1 %v2158_v39  ;;  %2704 = vmatmul.mubr.bf16.vlgmr.msra.gmra.mxu0 %v2158_v39  ;;  %v3241_v39 = vld [vmem:[%s4278_s11] ss:$0 sm:$0xff] }
 0x539   : > { %3308 = vmatprep.mubr.msk.bf16.mxu1 %vm3976_vm0, %v3975_v36  ;;  %3293 = vmatpush3.bf16.msra.mxu1 %v3779_v50 }
 0x53a   : > { %3294 = vmatprep.subr.bf16.mxu1 %v3975_v36 }
 0x53d   : > { %3295 = vmatpush3.bf16.msra.mxu1 %v3780_v53 }
 0x53e   : > { %3296 = vmatprep.subr.bf16.mxu1 %v3975_v36 }
 0x541   : > { %3297 = vmatpush3.bf16.msra.mxu1 %v3781_v54 }
 0x542   : > { %3298 = vmatprep.subr.bf16.mxu1 %v3975_v36 }
 0x545   : > { %3299 = vmatpush3.bf16.msra.mxu1 %v3782_v56 }
 0x546   : > { %3300 = vmatprep.subr.bf16.mxu1 %v3975_v36 }
 0x549   : > { %3301 = vmatpush3.bf16.msra.mxu1 %v3783_v57 }
 0x54a   : > { %3302 = vmatprep.subr.bf16.mxu1 %v3975_v36 }
 0x54d   : > { %3303 = vmatpush3.bf16.msra.mxu1 %v3784_v58 }
 0x54e   : > { %3304 = vmatprep.subr.bf16.mxu1 %v3975_v36 }
 0x551   : > { %3305 = vmatpush3.bf16.msra.mxu1 %v3785_v60  ;;  %v2909_v60 = vld [vmem:[%s2908_s3] sm:$0xf] }
 0x552   : > { %3306 = vmatprep.subr.bf16.mxu1 %v3975_v36 }
 0x555   : > { %3307 = vmatpush3.bf16.msra.mxu1 %v3786_v61 }
 0x5f8   : > { %v2664_v2 = vpop.f32.mrf.mxu1  ;;  %v2705_v3 = vpop.f32.mrf.mxu0 }
 0x5f9   : > { %v2665_v4 = vadd.f32 %v2664_v2, %v2422_v41  ;;  %v2706_v20 = vadd.f32 %v2705_v3, %v2463_v44  ;;  %v2911_v3 = vstv %s2906_s19 }
 0x5fa   : > { %v2666_v6 = vpop.f32.mrf.mxu1  ;;  %v2707_v7 = vpop.f32.mrf.mxu0 }
 0x5fb   : > { %v2735_v8 = vadd.f32 %v2718_v0, %v2665_v4  ;;  %v2667_v9 = vadd.f32 %v2666_v6, %v2424_v18  ;;  %v2708_v17 = vadd.f32 %v2707_v7, %v2465_v45  ;;  %v2737_v48 = vadd.f32 %v2726_v63, %v2706_v20 }
 0x5fc   : > { %v2668_v10 = vpop.f32.mrf.mxu1  ;;  %v2709_v11 = vpop.f32.mrf.mxu0  ;;  %v2910_v0 = vunpack.c.l.bf16 %v2909_v60 }
 0x5fd   : > { %v3238_v12 = vmul.f32 -1.442695, %v2735_v8  ;;  %v2736_v13 = vadd.f32 %v2722_v5, %v2667_v9  ;;  %v2738_v47 = vadd.f32 %v2730_v19, %v2708_v17  ;;  %v2914_v5 = vstv %s2913_s20 }
 0x5fe   : > { %v2669_v14 = vpop.f32.mrf.mxu1  ;;  %v2710_v16 = vpop.f32.mrf.mxu0  ;;  %v2912_v6 = vmul.f32 %v2911_v3, %v2910_v0 }
 0x5ff   : > { %3803 = vpow2.f32 %v3238_v12  ;;  %v3239_v1 = vmul.f32 -1.442695, %v2736_v13  ;;  %v3240_v21 = vmul.f32 -1.442695, %v2738_v47 }
 0x601   : > { %3805 = vpow2.f32 %v3239_v1 }
 0x602   : > { %3807 = vpow2.f32 %v3240_v21 }
 0x60c   : > { %v3804_v22 = vpop.eup %3803 }
 0x60d   : > { %v2744_v23 = vadd.f32 1.0, %v3804_v22 }
 0x60e   : > { %v3806_v24 = vpop.eup %3805 }
 0x60f   : > { %3809 = vrcp.f32 %v2744_v23  ;;  %v2750_v25 = vadd.f32 1.0, %v3806_v24  ;;  %v3808_v26 = vpop.eup %3807 }
 0x610   : > { %3811 = vtanh.f32 %v2737_v48  ;;  %v2757_v30 = vadd.f32 1.0, %v3808_v26 }
 0x611   : > { %3813 = vrcp.f32 %v2750_v25 }
 0x612   : > { %3815 = vrcp.f32 %v2757_v30 }
 0x61c   : > { %v3810_v27 = vpop.eup %3809 }
 0x61d   : > { %v3812_v52 = vpop.eup %3811 }
 0x61e   : > { %v3814_v29 = vpop.eup %3813  ;;  %v2761_v31 = vmul.f32 %v3812_v52, %v3810_v27 }
 0x61f   : > { %v2760_v32 = vmul.f32 %v3814_v29, %v2740_v28  ;;  %v3816_v33 = vpop.eup %3815 }
 0x621   : > { %v2762_v51 = vadd.f32 %v2761_v31, %v2760_v32 }
 0x623   : > { %2766 = vst [vmem:[#allocation3] sm:$0xff] %v2762_v51  ;;  %3817 = vtanh.f32 %v2762_v51 }
 0x630   : > { %v3818_v34 = vpop.eup %3817 }
 0x631   : > { %v2764_v35 = vmul.f32 %v3818_v34, %v3816_v33 }
 0x633   : > { %2765 = vst [vmem:[#allocation2 + $0x8] sm:$0xff] %v2764_v35  ;;  %v2767_v37 = vpack.c.bf16 %v2764_v35, %v2764_v35 }
 0x635   : > { %3309 = vmatmul.mubr.bf16.vlgmr.msra.gmra.mxu1 %v2767_v37 }
 0x6f5   : > { %v2873_v41 = vpop.f32.mrf.mxu1 }
 0x6f6   : > { %v2874_v18 = vadd.f32 %v3241_v39, %v2873_v41 }
 0x6f7   : > { %v3310_v42 = vpop.f32.mrf.mxu1 }
 0x6f8   : > { %2881 = vst [vmem:[%s2880_s13] sm:$0xff] %v2874_v18  ;;  %2882 = vmax.xlane.f32.xlu0 %v2874_v18 }
 0x6f9   : > { %v2876_v43 = vpop.f32.mrf.mxu1 }
 0x6fb   : > { %v3311_v44 = vpop.f32.mrf.mxu1 }
 0x781   : > { %v2883_v45 = vpop.xlane.xlu0 %2882 }
 0x782   : > { %vm2884_vm1 = vcmp.eq.f32.partialorder %v2874_v18, %v2883_v45 }
 0x783   : > { %v2885_v46 = vsel %vm2884_vm1, %v4132_v15, 128 }
 0x784   : > { %v2887_v49 = vshra.s32 %v2885_v46, 16  ;;  %v2886_v53 = vand.u32 65535, %v2885_v46 }
 0x786   : > { %v2889_v50 = vcvt.s32.f32 %v2887_v49  ;;  %v2888_v56 = vcvt.s32.f32 %v2886_v53 }
 0x788   : > { %2890 = vmin.xlane.f32.xlu0 %v2889_v50 }
 0x811   : > { %v2891_v54 = vpop.xlane.xlu0 %2890 }
 0x812   : > { %vm2892_vm2 = vcmp.eq.f32.partialorder %v2889_v50, %v2891_v54  ;;  %v2897_v58 = vcvt.f32.s32 %v2891_v54 }
 0x813   : > { %v2893_v57 = vsel %vm2892_vm2, %v2888_v56, inf }
 0x814   : > { %2894 = vmin.xlane.f32.xlu1 %v2893_v57  ;;  %v2898_v62 = vshll.u32 %v2897_v58, 16 }
 0x89d   : > { %v2895_v61 = vpop.xlane.xlu1 %2894 }
 0x89e   : > { %v2896_v2 = vcvt.f32.s32 %v2895_v61 }
 0x8a0   : > { %v2899_v4 = vadd.s32 %v2898_v62, %v2896_v2 }
 0x8a2   : > { %vm2900_vm3 = vcmp.eq.s32.totalorder %v4132_v15, %v2899_v4 }
 0x8a3   : > { %v3251_v7 = vsel %vm2900_vm3, 1.0, %v3975_v36 }
 0x8a4   : > { %v2915_v8 = vmul.f32 %v3251_v7, %v2914_v5  ;;  %1447 = sbr.rel (!%p1445_p13) target bundleno = 855 (0x357), region = 126 }
 0x8a6   : > { %v2916_v9 = vadd.f32 %v2915_v8, %v2912_v6 }
 0x8a8   : > { %v2917_v16 = vpack.c.bf16 %v2916_v9, %v2916_v9  }
 0x8a9   :  { %3922 = shalt.err (!%p3919_p4)
}
 0x8aa   :  { %s3979_s24 = smov 128   ;;  %s3980_s25 = smov 8  }
 0x8ab   :  { %2929 = dma.vmem_to_hbm [thread:$0]  %s2924_s22, 640, %s4279_s12, [#allocation7], %s3979_s24, %s3979_s24, %s3980_s25  }
 0x8ac   :  { %3951 = dma.done.wait [#allocation7], 640  }
 0x8ad   :  { %3952 = vsyncadd [#allocation7], 4294966656 }
 0x8ae   :  { %2933 = vsyncpa [#allocation6], 1 }
 0x8af   :  { %2934 = vsyncpa [#allocation11], 1 }
 0x8b0   :  { %2935 = vsyncpa [#allocation14], 1 }
 0x8b1   :  { %2936 = vsyncpa [#allocation7], 1 }
 0x8b2   :  { %2937 = vsyncpa [#allocation8], 1 }

</bundles_post_ra>
